<compile_context>
chip_gen: v5e
topology: v5e:2x2
jax: 0.10.0
libtpu: 0.0.40
codegen_flags: <defaults>
</compile_context>

<pallas_src>
import jax
import jax.numpy as jnp
from jax import lax
from jax.experimental import pallas as pl
from jax.experimental.pallas import tpu as pltpu

IN_FEATURES = 196608   # from Linear(196608, 10)
OUT_FEATURES = 10
TK = 16384             # reduction tile along K (196608 = 12 * 16384)
K_SPLIT = 2            # split the K stream across 2 cores (v7x megacore); fine on 1-TC chips


def linear_kernel(x_ref, w_ref, o_ref):
    # Grid: (core_split, k). o_ref block is constant across k -> resident accumulator.
    k = pl.program_id(1)

    @pl.when(k == 0)
    def _():
        o_ref[...] = jnp.zeros_like(o_ref)

    # x_ref: (B, tk), w_ref: (N, tk) -- contract the (lane-dense) last dims: bk,nk->bn
    o_ref[...] += lax.dot_general(
        x_ref[...],
        w_ref[...],
        dimension_numbers=(((1,), (1,)), ((), ())),
        preferred_element_type=jnp.float32,
    )


def pallas_linear(x, w, b, *, tk=TK, k_split=K_SPLIT):
    """x: (B, K), w: (N, K)  (native PyTorch Linear layout), b: (N,)."""
    B, K = x.shape
    N, K2 = w.shape
    assert K == K2
    assert K % (k_split * tk) == 0
    kt_per_split = K // (k_split * tk)

    partials = pl.pallas_call(
        linear_kernel,
        out_shape=jax.ShapeDtypeStruct((k_split, B, N), jnp.float32),
        grid_spec=pltpu.PrefetchScalarGridSpec(
            num_scalar_prefetch=0,
            grid=(k_split, kt_per_split),
            in_specs=[
                # x tile along K (K on lanes)
                pl.BlockSpec((B, tk), lambda c, k: (0, c * kt_per_split + k)),
                # weight tile along K, native (N, K) layout (K on lanes)
                pl.BlockSpec((N, tk), lambda c, k: (0, c * kt_per_split + k)),
            ],
            # one (B, N) partial per core-split slice; leading dim squeezed in-kernel
            out_specs=pl.BlockSpec((None, B, N), lambda c, k: (c, 0, 0)),
        ),
        compiler_params=pltpu.CompilerParams(
            dimension_semantics=("parallel", "arbitrary"),
        ),
        cost_estimate=pl.CostEstimate(
            flops=2 * B * K * N,
            transcendentals=0,
            bytes_accessed=(B * K + N * K) * x.dtype.itemsize
            + k_split * B * N * 4,
        ),
    )(x, w)

    # Tiny epilogue: sum the per-core partials and add the bias.
    return (partials.sum(axis=0) + b[None, :]).astype(x.dtype)


if __name__ == "__main__":
    key = jax.random.PRNGKey(0)
    kx, kw, kb = jax.random.split(key, 3)

    B = 2
    # PyTorch-style uniform(-1/sqrt(K), 1/sqrt(K)) init, native (N, K) weight layout.
    bound = 1.0 / (IN_FEATURES ** 0.5)
    w = jax.random.uniform(
        kw, (OUT_FEATURES, IN_FEATURES), jnp.float32, minval=-bound, maxval=bound
    )
    b = jax.random.uniform(
        kb, (OUT_FEATURES,), jnp.float32, minval=-bound, maxval=bound
    )
    x = jax.random.normal(kx, (B, IN_FEATURES), jnp.float32)

    out = pallas_linear(x, w, b)
    out = jax.block_until_ready(out)

    # Reference check (plain JAX) to make sure semantics match nn.Linear.
    ref = x @ w.T + b
    assert out.shape == (B, OUT_FEATURES)
    assert jnp.allclose(out, ref, atol=1e-3, rtol=1e-3)

    print("KERNEL_OK")
</pallas_src>

<mosaic_0001>
module attributes {stable_mosaic.version = 11 : i64} {
  func.func @linear_kernel(%arg0: i32, %arg1: i32, %arg2: memref<2x16384xf32, #tpu.memory_space<vmem>>, %arg3: memref<10x16384xf32, #tpu.memory_space<vmem>>, %arg4: memref<1x2x10xf32, #tpu.memory_space<vmem>>) attributes {dimension_semantics = [#tpu.dimension_semantics<parallel>, #tpu.dimension_semantics<arbitrary>], iteration_bounds = array<i64: 2, 6>, scalar_prefetch = 0 : i64, scratch_operands = 0 : i64, tpu.core_type = #tpu.core_type<tc>, window_params = [{transform_indices = @transform_0, window_bounds = array<i64: 2, 16384>}, {transform_indices = @transform_1, window_bounds = array<i64: 10, 16384>}, {transform_indices = @transform_2, window_bounds = array<i64: 1, 2, 10>}]} {
    %c0_i32 = arith.constant 0 : i32
    %0 = arith.cmpi eq, %arg1, %c0_i32 : i32
    %1 = arith.extui %0 : i1 to i32
    %c0_i32_0 = arith.constant 0 : i32
    %2 = arith.cmpi ne, %1, %c0_i32_0 : i32
    scf.if %2 {
      %cst_10 = arith.constant 0.000000e+00 : f32
      %12 = vector.broadcast %cst_10 : f32 to vector<2x10xf32>
      %c0_11 = arith.constant 0 : index
      %c0_12 = arith.constant 0 : index
      %c0_13 = arith.constant 0 : index
      %13 = vector.load %arg4[%c0_11, %c0_12, %c0_13] : memref<1x2x10xf32, #tpu.memory_space<vmem>>, vector<1x2x10xf32>
      %14 = vector.shape_cast %13 : vector<1x2x10xf32> to vector<2x10xf32>
      %15 = vector.shape_cast %12 : vector<2x10xf32> to vector<1x2x10xf32>
      tpu.vector_store %arg4[%c0_11, %c0_12, %c0_13], %15 {strides = array<i32>} : memref<1x2x10xf32, #tpu.memory_space<vmem>>, vector<1x2x10xf32>,
    } else {
    }
    %c0 = arith.constant 0 : index
    %c0_1 = arith.constant 0 : index
    %c0_2 = arith.constant 0 : index
    %3 = vector.load %arg4[%c0, %c0_1, %c0_2] : memref<1x2x10xf32, #tpu.memory_space<vmem>>, vector<1x2x10xf32>
    %4 = vector.shape_cast %3 : vector<1x2x10xf32> to vector<2x10xf32>
    %c0_3 = arith.constant 0 : index
    %c0_4 = arith.constant 0 : index
    %5 = vector.load %arg2[%c0_3, %c0_4] : memref<2x16384xf32, #tpu.memory_space<vmem>>, vector<2x16384xf32>
    %c0_5 = arith.constant 0 : index
    %c0_6 = arith.constant 0 : index
    %6 = vector.load %arg3[%c0_5, %c0_6] : memref<10x16384xf32, #tpu.memory_space<vmem>>, vector<10x16384xf32>
    %cst = arith.constant dense<0.000000e+00> : vector<2x10xf32>
    %7 = tpu.matmul %5, %6, %cst {dimension_numbers = #tpu.dot_dimension_numbers<[1], [1], [0], [0], [0, 0, 1, 0], [], []>} : vector<2x16384xf32>, vector<10x16384xf32>, vector<2x10xf32> -> vector<2x10xf32>
    %8 = arith.addf %4, %7 : vector<2x10xf32>
    %c0_7 = arith.constant 0 : index
    %c0_8 = arith.constant 0 : index
    %c0_9 = arith.constant 0 : index
    %9 = vector.load %arg4[%c0_7, %c0_8, %c0_9] : memref<1x2x10xf32, #tpu.memory_space<vmem>>, vector<1x2x10xf32>
    %10 = vector.shape_cast %9 : vector<1x2x10xf32> to vector<2x10xf32>
    %11 = vector.shape_cast %8 : vector<2x10xf32> to vector<1x2x10xf32>
    tpu.vector_store %arg4[%c0_7, %c0_8, %c0_9], %11 {strides = array<i32>} : memref<1x2x10xf32, #tpu.memory_space<vmem>>, vector<1x2x10xf32>,
    return
  }
  func.func @transform_0(%arg0: i32, %arg1: i32) -> (i32, i32) {
    %c6_i32 = arith.constant 6 : i32
    %0 = arith.muli %arg0, %c6_i32 : i32
    %1 = arith.addi %0, %arg1 : i32
    %c0_i32 = arith.constant 0 : i32
    %c0_i32_0 = arith.constant 0 : i32
    return %c0_i32, %1 : i32, i32
  }
  func.func @transform_1(%arg0: i32, %arg1: i32) -> (i32, i32) {
    %c6_i32 = arith.constant 6 : i32
    %0 = arith.muli %arg0, %c6_i32 : i32
    %1 = arith.addi %0, %arg1 : i32
    %c0_i32 = arith.constant 0 : i32
    %c0_i32_0 = arith.constant 0 : i32
    return %c0_i32, %1 : i32, i32
  }
  func.func @transform_2(%arg0: i32, %arg1: i32) -> (i32, i32, i32) {
    %c0_i32 = arith.constant 0 : i32
    %c0_i32_0 = arith.constant 0 : i32
    %c0_i32_1 = arith.constant 0 : i32
    return %arg0, %c0_i32, %c0_i32_0 : i32, i32, i32
  }
}

</mosaic_0001>

<bundles_post_ra>
// kernel: tpu_custom_call.1
= control target key start
LH: loop header
LB: loop body
LE: loop exit
PB: predicated region body
PF: predicated region fallthrough
CT: control target
= control target key end

     0   :  { %s4652_s0 = inlined_call_operand.hbm [shape: f32[2,196608], index: 0, kind: input, shape index: {}]   ;;  %s4653_s1 = inlined_call_operand.hbm [shape: f32[10,196608], index: 1, kind: input, shape index: {}]   ;;  %s4654_s2 = inlined_call_operand.hbm [shape: f32[2,2,10], index: 2, kind: output, shape index: {}]  }
   0x1   :  { %4659 = sst [smem:[#allocation16_spill]] %s4652_s0 }
   0x2   :  { %7 = vsyncpa [#allocation3], 0 }
   0x3   :  { %9 = vsyncpa [#allocation3 + $0x1], 0 }
   0x4   :  { %10 = vsyncpa [#allocation6], 0 }
   0x5   :  { %12 = vsyncpa [#allocation6 + $0x1], 0 }
   0x6   :  { %13 = vsyncpa [#allocation4], 0 }
   0x7   :  { %15 = vsyncpa [#allocation4 + $0x1], 0  ;;  %s3876_s9 = smov 0   ;;  %s3878_s10 = smov 0  }
   0x8   :  { %s3880_s11 = smov 0   ;;  %s3882_s12 = smov 0  }
   0x9   :  { %s3884_s13 = smov 0   ;;  %s3886_s14 = smov 0  }
   0xa   :  { %s3888_s15 = smov 0   ;;  %s3890_s16 = smov 0  }
   0xb   :  { %s3892_s17 = smov 0   ;;  %s3894_s18 = smov 0  }
   0xc   :  { %s3896_s19 = smov 0  }
   0xd LB: > { %4660 = sst [smem:[#allocation11_spill]] %s3847_s17  ;;  %s3537_s20 = sadd.s32 4294967295, %s3855_s19   ;;  %s3855_s19 = sphi %s3896_s19, %s21_s19   ;;  %s3851_s18 = sphi %s3894_s18, %s4675_s18   ;;  %s3847_s17 = sphi %s3892_s17, %s4674_s17   ;;  %s3843_s16 = sphi %s3890_s16, %s4673_s16   ;;  %s3839_s15 = sphi %s3888_s15, %s4672_s15   ;;  %s3835_s14 = sphi %s3886_s14, %s4681_s14   ;;  %s3831_s13 = sphi %s3884_s13, %s4680_s13   ;;  %s3827_s12 = sphi %s3882_s12, %s4679_s12   ;;  %s3823_s11 = sphi %s3880_s11, %s4678_s11   ;;  %s3819_s10 = sphi %s3878_s10, %s4677_s10   ;;  %s3815_s9 = sphi %s3876_s9, %s4676_s9  }
   0xe   : > { %4661 = sst [smem:[#allocation12_spill]] %s3851_s18  ;;  %s3538_s21 = sadd.s32 4294967294, %s3855_s19  }
   0xf   : > { %s30_s22 = sadd.s32 1, %s3847_s17  ;;  %s33_s23 = sadd.s32 1, %s3851_s18 }
  0x10   : > { %p31_p0 = scmp.ge.s32.totalorder %s30_s22, 6  ;;  %s37_s24 = smul.u32 6, %s3851_s18 }
  0x11   : > { %s44_s25 = sadd.s32 1, %s3835_s14  ;;  %p51_p1 = scmp.ne.s32.totalorder %s3835_s14, %s3831_s13 }
  0x12   : > { %s4683_s22 = smov (%p31_p0, %s30_s22), 0  ;;  %s4685_s23 = smov (!%p31_p0, %s33_s23), %s3851_s18 }
  0x13   : > { %4662 = sst [smem:[#allocation13_spill]] %s4683_s22  ;;  %s3941_s26 = sadd.s32 %s3847_s17, %s37_s24 }
  0x14   : > { %p52_p2 = scmp.eq.s32.totalorder %s3855_s19, 0  ;;  %p35_p3 = scmp.ge.s32.totalorder %s4685_s23, 2 }
  0x15   : > { %p57_p4 = scmp.ne.s32.totalorder %s3831_s13, %s3827_s12  ;;  %p58_p6 = scmp.eq.s32.totalorder %s3537_s20, 0 }
  0x16   : > { %p3945_p5 = por %p52_p2, %p51_p1  ;;  %s4687_s23 = smov (%p35_p3, %s4685_s23), 0 }
  0x17   : > { %4664 = sst [smem:[#allocation14_spill]] %s4687_s23  ;;  %p3951_p7 = por %p58_p6, %p57_p4 }
  0x18   : > { %s100_s29 = sadd.s32 1, %s3823_s11  ;;  %s39_s30 = smul.u32 6, %s4687_s23 }
  0x19   : > { %s97_s3 = ssub.s32 %s3851_s18, %s4687_s23  ;;  %p110_p9 = scmp.ne.s32.totalorder %s3823_s11, %s3819_s10 }
  0x1a   : > { %p98_p8 = scmp.eq.s32.totalorder %s97_s3, 0  ;;  %s40_s4 = sadd.s32 %s39_s30, %s4683_s22 }
  0x1b   : > { %p111_p10 = scmp.eq.s32.totalorder %s3537_s20, 11  ;;  %s41_s5 = ssub.s32 %s3941_s26, %s40_s4 }
  0x1c   : > { %p116_p11 = scmp.ne.s32.totalorder %s3819_s10, %s3815_s9  ;;  %p42_p12 = scmp.eq.s32.totalorder %s41_s5, 0 }
  0x1d   : > { %p3965_p13 = por %p111_p10, %p110_p9  ;;  %p117_p0 = scmp.eq.s32.totalorder %s3538_s21, 11 }
  0x1e   : > { %s3970_s7 = scalar_select %p98_p8, %s3823_s11, %s100_s29  }
  0x1f   : > { %s3973_s8 = scalar_select %p42_p12, %s3835_s14, %s44_s25  }
  0x20   : > { %p3575_p1 = scmp.lt.s32.totalorder %s3855_s19, 12  ;;  %s3979_s12 = sand.u32 1, %s3835_s14  }
  0x21   : > { %4667 = sst [smem:[#allocation15_spill]] %s3973_s8  ;;  %p3981_p2 = por %p117_p0, %p116_p11 }
  0x22   : > { %s3541_s24 = sshll.u32 %s3979_s12, 8  ;;  %s3556_s29 = sshll.u32 %s3941_s26, 8 }
  0x23   : > { %s4669_s0 = sld [smem:[#allocation16_spill]]  ;;  %s141_s21 = scalar_lea.vmem [#allocation2], %s3541_s24 }
  0x24   : > { %s152_s5 = sshll.u32 %s141_s21, 4  ;;  %p3992_p3 = pnand %p3575_p1, %p3945_p5  ;;  %s153_s5 = int_to_ptr.vmem [resolvable:$true] %s152_s5 }
  0x25   : > { %s3544_s22 = sshll.u32 %s3979_s12, 11  ;;  %s3557_s18 = sshll.u32 %s3941_s26, 10 }
  0x26   : > { %s138_s17 = scalar_lea.sflag [#allocation3], %s3979_s12  ;;  %s170_s24 = scalar_lea.hbm %s4653_s1, %s3557_s18 }
  0x27   : > { %p3547_p4 = scmp.ge.s32.totalorder %s3855_s19, 1  ;;  %s171_s3 = sshll.u32 %s170_s24, 4  ;;  %s172_s3 = int_to_ptr.hbm [resolvable:$true] %s171_s3 }
  0x28   : > { %p181_p6 = scmp.lt.s32.totalorder %s3855_s19, 13  ;;  %s163_s27 = scalar_lea.vmem [#allocation5], %s3544_s22 }
  0x29   : > { %s148_s25 = scalar_lea.hbm %s4669_s0, %s3556_s29  ;;  %s160_s21 = scalar_lea.sflag [#allocation6], %s3979_s12 }
  0x2a   : > { %s150_s4 = sshll.u32 %s148_s25, 4  ;;  %s173_s25 = sshll.u32 %s163_s27, 4  ;;  %s151_s4 = int_to_ptr.hbm [resolvable:$true] %s150_s4  ;;  %s174_s25 = int_to_ptr.vmem [resolvable:$true] %s173_s25 }
  0x2b   : > { %3567 = dma.hbm_to_vmem [thread:$0]  (!%p3992_p3), %s151_s4, 4096, %s153_s5, %s138_s17  }
  0x2c   : > { %p182_p5 = pnand %p3547_p4, %p181_p6  ;;  %s3857_s0 = smov 196608  }
  0x2d   : > { %s3858_s8 = smov 16384   ;;  %s3859_s26 = smov 1024  }
  0x2e   : > { %3570 = dma.hbm_to_vmem [thread:$0]  (!%p3992_p3), %s172_s3, 32768, %s174_s25, %s160_s21, %s3857_s0, %s3858_s8, %s3859_s26  }
  0x2f   : > { %185 = sbr.rel (%p182_p5) target bundleno = 465 (0x1d1), region = 28  ;;  %s187_s17 = sand.u32 (!%p182_p5), 1, %s3831_s13  }
  0x30   : > { %s3548_s4 = sshll.u32 (!%p182_p5), %s187_s17, 8  ;;  %s188_s18 = scalar_lea.sflag (!%p182_p5), [#allocation3], %s187_s17 }
  0x31   : > { %s4010_s5 = scalar_lea.vmem (!%p182_p5), [#allocation2], %s3548_s4 }
  0x34   : > { %3802 = dma.done.wait (%p3951_p7), %s188_s18, 4096  }
  0x35   : > { %3804 = vsyncadd (%p3951_p7), %s188_s18, 4294963200  ;;  %s3549_s22 = sshll.u32 %s187_s17, 11  ;;  %s198_s12 = scalar_lea.sflag [#allocation6], %s187_s17 }
  0x36   : > { %s4016_s30 = scalar_lea.vmem [#allocation5], %s3549_s22 }
  0x37   : > { %3806 = dma.done.wait (%p3951_p7), %s198_s12, 32768  }
  0x38   : > { %3808 = vsyncadd (%p3951_p7), %s198_s12, 4294934528  ;;  %s225_s0 = sand.u32 1, %s3819_s10   ;;  %p3551_p8 = scmp.ne.s32.totalorder %s3839_s15, 0 }
  0x39   : > { %s3550_s23 = sshll.u32 %s225_s0, 1 }
  0x3a   : > { %s4025_s8 = scalar_lea.vmem [#allocation7], %s3550_s23  ;;  %237 = sbr.rel (%p3551_p8) target bundleno = 65 (0x41), region = 40 }
  0x3f   : > { %vm238_vm0 = vcmask 74752   ;;  %v3860_v0 = vmov 0.0  }
  0x40   : > { %239 = vst.msk [vmem:[%s4025_s8] sm:$0x3] %vm238_vm0, %v3860_v0 }
  0x41 PF: > { %v403_v1 = vld [vmem:[%s4016_s30 + $0x410] sm:$0x3]  ;;  %v401_v2 = vld [vmem:[%s4016_s30 + $0x400] sm:$0x3]  ;;  %v402_v3 = vld [vmem:[%s4016_s30 + $0x408] sm:$0x3] }
  0x42   : > { %904 = vmatpush.xpose.msra.mxu2 %v403_v1  ;;  %864 = vmatpush.xpose.msra.mxu0 %v401_v2  ;;  %v404_v4 = vld [vmem:[%s4016_s30 + $0x418] sm:$0x3]  ;;  %v275_v5 = vld [vmem:[%s4016_s30 + $0x10] sm:$0xff]  ;;  %v273_v6 = vld [vmem:[%s4016_s30] sm:$0xff]  ;;  %s3553_s15 = sshll.u32 %s3843_s16, 1  ;;  %s3426_s3 = sshll.u32 %s4025_s8, 4  ;;  %s3427_s3 = int_to_ptr.vmem [resolvable:$true] %s3426_s3 }
  0x43   : > { %884 = vmatpush.xpose.msra.mxu1 %v402_v3  ;;  %924 = vmatpush.xpose.msra.mxu3 %v404_v4  ;;  %v241_v7 = vld [vmem:[%s4010_s5] sm:$0xff]  ;;  %v274_v8 = vld [vmem:[%s4016_s30 + $0x8] sm:$0xff]  ;;  %v276_v9 = vld [vmem:[%s4016_s30 + $0x18] sm:$0xff]  ;;  %s3424_s24 = scalar_lea.hbm %s4654_s2, %s3553_s15  ;;  %vm3411_vm1 = vcmask 74752   ;;  %s3414_s16 = scalar_lea.sflag [#allocation4], %s225_s0 }
  0x44   : > { %561 = vst [vmem:[#allocation1] ss:$4 sm:$0xff] %v241_v7  ;;  %v407_v10 = vld [vmem:[%s4016_s30 + $0x430] sm:$0x3]  ;;  %v405_v11 = vld [vmem:[%s4016_s30 + $0x420] sm:$0x3] }
  0x45   : > { %v408_v12 = vld [vmem:[%s4016_s30 + $0x438] sm:$0x3]  ;;  %v406_v13 = vld [vmem:[%s4016_s30 + $0x428] sm:$0x3]  ;;  %v279_v15 = vld [vmem:[%s4016_s30 + $0x30] sm:$0xff]  ;;  %s3428_s27 = sshll.u32 %s3424_s24, 4  ;;  %s3429_s27 = int_to_ptr.hbm [resolvable:$true] %s3428_s27 }
  0x46   : > { %905 = vmatpush.xpose.msra.mxu2 %v275_v5  ;;  %865 = vmatpush.xpose.msra.mxu0 %v273_v6  ;;  %v242_v14 = vld [vmem:[%s4010_s5 + $0x8] sm:$0xff]  ;;  %v277_v16 = vld [vmem:[%s4016_s30 + $0x20] sm:$0xff]  ;;  %v280_v17 = vld [vmem:[%s4016_s30 + $0x38] sm:$0xff]  ;;  %s3743_s25 = sshra.s32 %s3429_s27, 4  ;;  %s3749_s4 = scalar_lea.hbm %s4654_s2, 4  ;;  %s3744_s25 = int_to_ptr.hbm [resolvable:$true] %s3743_s25 }
  0x47   : > { %885 = vmatpush.xpose.msra.mxu1 %v274_v8  ;;  %925 = vmatpush.xpose.msra.mxu3 %v276_v9  ;;  %563 = vst [vmem:[#allocation1 + $0x20] ss:$4 sm:$0xff] %v242_v14  ;;  %v278_v18 = vld [vmem:[%s4016_s30 + $0x28] sm:$0xff]  ;;  %v243_v19 = vld [vmem:[%s4010_s5 + $0x10] sm:$0xff]  ;;  %v409_v25 = vld [vmem:[%s4016_s30 + $0x440] sm:$0x3]  ;;  %p3750_p11 = scmp.lt.s32.totalorder %s3744_s25, %s4654_s2 }
  0x48   : > { %v411_v24 = vld [vmem:[%s4016_s30 + $0x450] sm:$0x3]  ;;  %v412_v26 = vld [vmem:[%s4016_s30 + $0x458] sm:$0x3]  ;;  %v410_v27 = vld [vmem:[%s4016_s30 + $0x448] sm:$0x3] }
  0x49   : > { %v244_v32 = vld [vmem:[%s4010_s5 + $0x18] sm:$0xff]  ;;  %v283_v33 = vld [vmem:[%s4016_s30 + $0x50] sm:$0xff]  ;;  %v281_v34 = vld [vmem:[%s4016_s30 + $0x40] sm:$0xff]  ;;  %s3745_s21 = scalar_lea.hbm %s3744_s25, 2 }
  0x4a   : > { %984 = vmatpush.xpose.msrb.mxu2 %v407_v10  ;;  %944 = vmatpush.xpose.msrb.mxu0 %v405_v11  ;;  %v284_v35 = vld [vmem:[%s4016_s30 + $0x58] sm:$0xff]  ;;  %v282_v36 = vld [vmem:[%s4016_s30 + $0x48] sm:$0xff]  ;;  %v415_v37 = vld [vmem:[%s4016_s30 + $0x470] sm:$0x3]  ;;  %p3746_p7 = scmp.ne.s32.totalorder %s3744_s25, %s3745_s21  ;;  %p3751_p12 = scmp.lt.s32.totalorder %s3749_s4, %s3745_s21 }
  0x4b   : > { %1004 = vmatpush.xpose.msrb.mxu3 %v408_v12  ;;  %964 = vmatpush.xpose.msrb.mxu1 %v406_v13  ;;  %v566_v20 = vld.sshfl [vmem:[#allocation1 + $0x10] sm:$0xff pattern:$0x73625140]  ;;  %v564_v21 = vld.sshfl [vmem:[#allocation1] sm:$0xff pattern:$0x73625140] }
  0x4c   : > { %906 = vmatmul.f32.vlgmr.msra.gmra.mxu2 %v566_v20  ;;  %866 = vmatmul.f32.vlgmr.msra.gmra.mxu0 %v564_v21  ;;  %v565_v22 = vld.sshfl [vmem:[#allocation1 + $0x8] sm:$0xff pattern:$0x73625140]  ;;  %v567_v23 = vld.sshfl [vmem:[#allocation1 + $0x18] sm:$0xff pattern:$0x73625140]  ;;  %p3747_p9 = pnand %p3746_p7, %p3965_p13  ;;  %p3752_p0 = por %p3751_p12, %p3750_p11 }
  0x4d   : > { %886 = vmatmul.f32.vlgmr.msra.gmra.mxu1 %v565_v22  ;;  %926 = vmatmul.f32.vlgmr.msra.gmra.mxu3 %v567_v23  ;;  %572 = vst [vmem:[#allocation1] ss:$4 sm:$0xff] %v243_v19  ;;  %v413_v38 = vld [vmem:[%s4016_s30 + $0x460] sm:$0x3]  ;;  %v416_v39 = vld [vmem:[%s4016_s30 + $0x478] sm:$0x3] }
  0x4e   : > { %985 = vmatpush.xpose.msrb.mxu2 %v279_v15  ;;  %945 = vmatpush.xpose.msrb.mxu0 %v277_v16  ;;  %v570_v28 = vld.sshfl [vmem:[#allocation1 + $0x30] sm:$0xff pattern:$0x73625140]  ;;  %v568_v29 = vld.sshfl [vmem:[#allocation1 + $0x20] sm:$0xff pattern:$0x73625140]  ;;  %p3748_p10 = pneg %p3747_p9 }
  0x4f   : > { %1005 = vmatpush.xpose.msrb.mxu3 %v280_v17  ;;  %965 = vmatpush.xpose.msrb.mxu1 %v278_v18  ;;  %v571_v30 = vld.sshfl [vmem:[#allocation1 + $0x38] sm:$0xff pattern:$0x73625140]  ;;  %v569_v31 = vld.sshfl [vmem:[#allocation1 + $0x28] sm:$0xff pattern:$0x73625140] }
  0x50   : > { %573 = vst [vmem:[#allocation1 + $0x20] ss:$4 sm:$0xff] %v244_v32  ;;  %v414_v41 = vld [vmem:[%s4016_s30 + $0x468] sm:$0x3]  ;;  %v245_v45 = vld [vmem:[%s4010_s5 + $0x20] sm:$0xff]  ;;  %v287_v46 = vld [vmem:[%s4016_s30 + $0x70] sm:$0xff]  ;;  %p3753_p1 = pnand %p3752_p0, %p3748_p10 }
  0x51   : > { %v285_v47 = vld [vmem:[%s4016_s30 + $0x60] sm:$0xff]  ;;  %v288_v48 = vld [vmem:[%s4016_s30 + $0x78] sm:$0xff]  ;;  %v286_v52 = vld [vmem:[%s4016_s30 + $0x68] sm:$0xff] }
  0x52   : > { %1064 = vmatpush.xpose.msra.mxu2 %v411_v24  ;;  %1024 = vmatpush.xpose.msra.mxu0 %v409_v25  ;;  %v246_v54 = vld [vmem:[%s4010_s5 + $0x28] sm:$0xff]  ;;  %v419_v55 = vld [vmem:[%s4016_s30 + $0x490] sm:$0x3]  ;;  %v417_v56 = vld [vmem:[%s4016_s30 + $0x480] sm:$0x3] }
  0x53   : > { %1084 = vmatpush.xpose.msra.mxu3 %v412_v26  ;;  %1044 = vmatpush.xpose.msra.mxu1 %v410_v27  ;;  %v420_v57 = vld [vmem:[%s4016_s30 + $0x498] sm:$0x3]  ;;  %v418_v58 = vld [vmem:[%s4016_s30 + $0x488] sm:$0x3]  ;;  %v247_v63 = vld [vmem:[%s4010_s5 + $0x30] sm:$0xff] }
  0x54   : > { %986 = vmatmul.f32.vlgmr.msrb.gmra.mxu2 %v570_v28  ;;  %946 = vmatmul.f32.vlgmr.msrb.gmra.mxu0 %v568_v29  ;;  %v576_v40 = vld.sshfl [vmem:[#allocation1 + $0x10] sm:$0xff pattern:$0x73625140]  ;;  %v574_v42 = vld.sshfl [vmem:[#allocation1] sm:$0xff pattern:$0x73625140] }
  0x55   : > { %1006 = vmatmul.f32.vlgmr.msrb.gmra.mxu3 %v571_v30  ;;  %966 = vmatmul.f32.vlgmr.msrb.gmra.mxu1 %v569_v31  ;;  %v577_v43 = vld.sshfl [vmem:[#allocation1 + $0x18] sm:$0xff pattern:$0x73625140]  ;;  %v575_v44 = vld.sshfl [vmem:[#allocation1 + $0x8] sm:$0xff pattern:$0x73625140] }
  0x56   : > { %1065 = vmatpush.xpose.msra.mxu2 %v283_v33  ;;  %1025 = vmatpush.xpose.msra.mxu0 %v281_v34  ;;  %582 = vst [vmem:[#allocation1] ss:$4 sm:$0xff] %v245_v45  ;;  %v291_v0 = vld [vmem:[%s4016_s30 + $0x90] sm:$0xff]  ;;  %v289_v1 = vld [vmem:[%s4016_s30 + $0x80] sm:$0xff]  ;;  %v292_v2 = vld [vmem:[%s4016_s30 + $0x98] sm:$0xff] }
  0x57   : > { %1085 = vmatpush.xpose.msra.mxu3 %v284_v35  ;;  %1045 = vmatpush.xpose.msra.mxu1 %v282_v36  ;;  %v580_v49 = vld.sshfl [vmem:[#allocation1 + $0x30] sm:$0xff pattern:$0x73625140]  ;;  %v578_v50 = vld.sshfl [vmem:[#allocation1 + $0x20] sm:$0xff pattern:$0x73625140] }
  0x58   : > { %v581_v51 = vld.sshfl [vmem:[#allocation1 + $0x38] sm:$0xff pattern:$0x73625140]  ;;  %v579_v53 = vld.sshfl [vmem:[#allocation1 + $0x28] sm:$0xff pattern:$0x73625140] }
  0x59   : > { %583 = vst [vmem:[#allocation1 + $0x20] ss:$4 sm:$0xff] %v246_v54  ;;  %v290_v3 = vld [vmem:[%s4016_s30 + $0x88] sm:$0xff]  ;;  %v423_v4 = vld [vmem:[%s4016_s30 + $0x4b0] sm:$0x3]  ;;  %v248_v12 = vld [vmem:[%s4010_s5 + $0x38] sm:$0xff] }
  0x5a   : > { %1144 = vmatpush.xpose.msrb.mxu2 %v415_v37  ;;  %1104 = vmatpush.xpose.msrb.mxu0 %v413_v38  ;;  %v421_v5 = vld [vmem:[%s4016_s30 + $0x4a0] sm:$0x3]  ;;  %v424_v6 = vld [vmem:[%s4016_s30 + $0x4b8] sm:$0x3]  ;;  %v422_v7 = vld [vmem:[%s4016_s30 + $0x4a8] sm:$0x3] }
  0x5b   : > { %1164 = vmatpush.xpose.msrb.mxu3 %v416_v39  ;;  %1124 = vmatpush.xpose.msrb.mxu1 %v414_v41  ;;  %v295_v13 = vld [vmem:[%s4016_s30 + $0xb0] sm:$0xff]  ;;  %v293_v14 = vld [vmem:[%s4016_s30 + $0xa0] sm:$0xff]  ;;  %v296_v15 = vld [vmem:[%s4016_s30 + $0xb8] sm:$0xff] }
  0x5c   : > { %1066 = vmatmul.f32.vlgmr.msra.gmra.mxu2 %v576_v40  ;;  %1026 = vmatmul.f32.vlgmr.msra.gmra.mxu0 %v574_v42  ;;  %v294_v19 = vld [vmem:[%s4016_s30 + $0xa8] sm:$0xff]  ;;  %v249_v21 = vld [vmem:[%s4010_s5 + $0x40] sm:$0xff]  ;;  %v427_v22 = vld [vmem:[%s4016_s30 + $0x4d0] sm:$0x3] }
  0x5d   : > { %1086 = vmatmul.f32.vlgmr.msra.gmra.mxu3 %v577_v43  ;;  %1046 = vmatmul.f32.vlgmr.msra.gmra.mxu1 %v575_v44  ;;  %v586_v59 = vld.sshfl [vmem:[#allocation1 + $0x10] sm:$0xff pattern:$0x73625140]  ;;  %v584_v60 = vld.sshfl [vmem:[#allocation1] sm:$0xff pattern:$0x73625140] }
  0x5e   : > { %1145 = vmatpush.xpose.msrb.mxu2 %v287_v46  ;;  %1105 = vmatpush.xpose.msrb.mxu0 %v285_v47  ;;  %v587_v61 = vld.sshfl [vmem:[#allocation1 + $0x18] sm:$0xff pattern:$0x73625140]  ;;  %v585_v62 = vld.sshfl [vmem:[#allocation1 + $0x8] sm:$0xff pattern:$0x73625140] }
  0x5f   : > { %1165 = vmatpush.xpose.msrb.mxu3 %v288_v48  ;;  %1125 = vmatpush.xpose.msrb.mxu1 %v286_v52  ;;  %592 = vst [vmem:[#allocation1] ss:$4 sm:$0xff] %v247_v63  ;;  %v425_v23 = vld [vmem:[%s4016_s30 + $0x4c0] sm:$0x3]  ;;  %v428_v24 = vld [vmem:[%s4016_s30 + $0x4d8] sm:$0x3] }
  0x60   : > { %v590_v8 = vld.sshfl [vmem:[#allocation1 + $0x30] sm:$0xff pattern:$0x73625140]  ;;  %v588_v9 = vld.sshfl [vmem:[#allocation1 + $0x20] sm:$0xff pattern:$0x73625140] }
  0x61   : > { %v591_v10 = vld.sshfl [vmem:[#allocation1 + $0x38] sm:$0xff pattern:$0x73625140]  ;;  %v589_v11 = vld.sshfl [vmem:[#allocation1 + $0x28] sm:$0xff pattern:$0x73625140] }
  0x62   : > { %1224 = vmatpush.xpose.msra.mxu2 %v419_v55  ;;  %1184 = vmatpush.xpose.msra.mxu0 %v417_v56  ;;  %593 = vst [vmem:[#allocation1 + $0x20] ss:$4 sm:$0xff] %v248_v12  ;;  %v426_v25 = vld [vmem:[%s4016_s30 + $0x4c8] sm:$0x3]  ;;  %v299_v31 = vld [vmem:[%s4016_s30 + $0xd0] sm:$0xff]  ;;  %v297_v32 = vld [vmem:[%s4016_s30 + $0xc0] sm:$0xff] }
  0x63   : > { %1244 = vmatpush.xpose.msra.mxu3 %v420_v57  ;;  %1204 = vmatpush.xpose.msra.mxu1 %v418_v58  ;;  %v250_v30 = vld [vmem:[%s4010_s5 + $0x48] sm:$0xff]  ;;  %v300_v33 = vld [vmem:[%s4016_s30 + $0xd8] sm:$0xff]  ;;  %v431_v35 = vld [vmem:[%s4016_s30 + $0x4f0] sm:$0x3] }
  0x64   : > { %1146 = vmatmul.f32.vlgmr.msrb.gmra.mxu2 %v580_v49  ;;  %1106 = vmatmul.f32.vlgmr.msrb.gmra.mxu0 %v578_v50  ;;  %v298_v34 = vld [vmem:[%s4016_s30 + $0xc8] sm:$0xff]  ;;  %v429_v36 = vld [vmem:[%s4016_s30 + $0x4e0] sm:$0x3]  ;;  %v432_v37 = vld [vmem:[%s4016_s30 + $0x4f8] sm:$0x3] }
  0x65   : > { %1166 = vmatmul.f32.vlgmr.msrb.gmra.mxu3 %v581_v51  ;;  %1126 = vmatmul.f32.vlgmr.msrb.gmra.mxu1 %v579_v53  ;;  %v430_v38 = vld [vmem:[%s4016_s30 + $0x4e8] sm:$0x3]  ;;  %v251_v39 = vld [vmem:[%s4010_s5 + $0x50] sm:$0xff]  ;;  %v301_v48 = vld [vmem:[%s4016_s30 + $0xe0] sm:$0xff] }
  0x66   : > { %1225 = vmatpush.xpose.msra.mxu2 %v291_v0  ;;  %1185 = vmatpush.xpose.msra.mxu0 %v289_v1  ;;  %v596_v16 = vld.sshfl [vmem:[#allocation1 + $0x10] sm:$0xff pattern:$0x73625140]  ;;  %v594_v17 = vld.sshfl [vmem:[#allocation1] sm:$0xff pattern:$0x73625140] }
  0x67   : > { %1245 = vmatpush.xpose.msra.mxu3 %v292_v2  ;;  %1205 = vmatpush.xpose.msra.mxu1 %v290_v3  ;;  %v4084_v18 = vld.sshfl [vmem:[#allocation1 + $0x18] sm:$0xff pattern:$0x73625140]  ;;  %v595_v20 = vld.sshfl [vmem:[#allocation1 + $0x8] sm:$0xff pattern:$0x73625140] }
  0x68   : > { %602 = vst [vmem:[#allocation1] ss:$4 sm:$0xff] %v249_v21  ;;  %v303_v44 = vld [vmem:[%s4016_s30 + $0xf0] sm:$0xff]  ;;  %v252_v50 = vld [vmem:[%s4010_s5 + $0x58] sm:$0xff]  ;;  %v302_v52 = vld [vmem:[%s4016_s30 + $0xe8] sm:$0xff] }
  0x69   : > { %v4092_v26 = vld.sshfl [vmem:[#allocation1 + $0x30] sm:$0xff pattern:$0x73625140]  ;;  %v4094_v27 = vld.sshfl [vmem:[#allocation1 + $0x20] sm:$0xff pattern:$0x73625140] }
  0x6a   : > { %1304 = vmatpush.xpose.msrb.mxu2 %v423_v4  ;;  %1264 = vmatpush.xpose.msrb.mxu0 %v421_v5  ;;  %v4096_v28 = vld.sshfl [vmem:[#allocation1 + $0x38] sm:$0xff pattern:$0x73625140]  ;;  %v4098_v29 = vld.sshfl [vmem:[#allocation1 + $0x28] sm:$0xff pattern:$0x73625140] }
  0x6b   : > { %1324 = vmatpush.xpose.msrb.mxu3 %v424_v6  ;;  %1284 = vmatpush.xpose.msrb.mxu1 %v422_v7  ;;  %603 = vst [vmem:[#allocation1 + $0x20] ss:$4 sm:$0xff] %v250_v30  ;;  %v304_v51 = vld [vmem:[%s4016_s30 + $0xf8] sm:$0xff]  ;;  %v435_v53 = vld [vmem:[%s4016_s30 + $0x510] sm:$0x3]  ;;  %v305_v58 = vld [vmem:[%s4016_s30 + $0x100] sm:$0xff] }
  0x6c   : > { %1226 = vmatmul.f32.vlgmr.msra.gmra.mxu2 %v586_v59  ;;  %1186 = vmatmul.f32.vlgmr.msra.gmra.mxu0 %v584_v60  ;;  %v433_v54 = vld [vmem:[%s4016_s30 + $0x500] sm:$0x3]  ;;  %v436_v55 = vld [vmem:[%s4016_s30 + $0x518] sm:$0x3]  ;;  %v434_v56 = vld [vmem:[%s4016_s30 + $0x508] sm:$0x3] }
  0x6d   : > { %1246 = vmatmul.f32.vlgmr.msra.gmra.mxu3 %v587_v61  ;;  %1206 = vmatmul.f32.vlgmr.msra.gmra.mxu1 %v585_v62  ;;  %v307_v57 = vld [vmem:[%s4016_s30 + $0x110] sm:$0xff]  ;;  %v308_v59 = vld [vmem:[%s4016_s30 + $0x118] sm:$0xff]  ;;  %v306_v60 = vld [vmem:[%s4016_s30 + $0x108] sm:$0xff] }
  0x6e   : > { %1305 = vmatpush.xpose.msrb.mxu2 %v295_v13  ;;  %1265 = vmatpush.xpose.msrb.mxu0 %v293_v14  ;;  %v439_v61 = vld [vmem:[%s4016_s30 + $0x530] sm:$0x3]  ;;  %v437_v62 = vld [vmem:[%s4016_s30 + $0x520] sm:$0x3]  ;;  %v440_v63 = vld [vmem:[%s4016_s30 + $0x538] sm:$0x3] }
  0x6f   : > { %1325 = vmatpush.xpose.msrb.mxu3 %v296_v15  ;;  %1285 = vmatpush.xpose.msrb.mxu1 %v294_v19  ;;  %v4110_v40 = vld.sshfl [vmem:[#allocation1 + $0x10] sm:$0xff pattern:$0x73625140]  ;;  %v4112_v41 = vld.sshfl [vmem:[#allocation1] sm:$0xff pattern:$0x73625140] }
  0x70   : > { %v4114_v42 = vld.sshfl [vmem:[#allocation1 + $0x18] sm:$0xff pattern:$0x73625140]  ;;  %v4116_v43 = vld.sshfl [vmem:[#allocation1 + $0x8] sm:$0xff pattern:$0x73625140] }
  0x71   : > { %612 = vst [vmem:[#allocation1] ss:$4 sm:$0xff] %v251_v39  ;;  %v438_v0 = vld [vmem:[%s4016_s30 + $0x528] sm:$0x3]  ;;  %v253_v1 = vld [vmem:[%s4010_s5 + $0x60] sm:$0xff]  ;;  %v311_v6 = vld [vmem:[%s4016_s30 + $0x130] sm:$0xff] }
  0x72   : > { %1384 = vmatpush.xpose.msra.mxu2 %v427_v22  ;;  %1344 = vmatpush.xpose.msra.mxu0 %v425_v23  ;;  %v4119_v45 = vld.sshfl [vmem:[#allocation1 + $0x30] sm:$0xff pattern:$0x73625140]  ;;  %v4121_v46 = vld.sshfl [vmem:[#allocation1 + $0x20] sm:$0xff pattern:$0x73625140] }
  0x73   : > { %1404 = vmatpush.xpose.msra.mxu3 %v428_v24  ;;  %1364 = vmatpush.xpose.msra.mxu1 %v426_v25  ;;  %v4123_v47 = vld.sshfl [vmem:[#allocation1 + $0x38] sm:$0xff pattern:$0x73625140]  ;;  %v4126_v49 = vld.sshfl [vmem:[#allocation1 + $0x28] sm:$0xff pattern:$0x73625140] }
  0x74   : > { %1306 = vmatmul.f32.vlgmr.msrb.gmra.mxu2 %v590_v8  ;;  %1266 = vmatmul.f32.vlgmr.msrb.gmra.mxu0 %v588_v9  ;;  %613 = vst [vmem:[#allocation1 + $0x20] ss:$4 sm:$0xff] %v252_v50  ;;  %v254_v12 = vld [vmem:[%s4010_s5 + $0x68] sm:$0xff]  ;;  %v312_v13 = vld [vmem:[%s4016_s30 + $0x138] sm:$0xff]  ;;  %v443_v15 = vld [vmem:[%s4016_s30 + $0x550] sm:$0x3] }
  0x75   : > { %1326 = vmatmul.f32.vlgmr.msrb.gmra.mxu3 %v591_v10  ;;  %1286 = vmatmul.f32.vlgmr.msrb.gmra.mxu1 %v589_v11  ;;  %v309_v10 = vld [vmem:[%s4016_s30 + $0x120] sm:$0xff]  ;;  %v310_v14 = vld [vmem:[%s4016_s30 + $0x128] sm:$0xff]  ;;  %v315_v19 = vld [vmem:[%s4016_s30 + $0x150] sm:$0xff] }
  0x76   : > { %1385 = vmatpush.xpose.msra.mxu2 %v299_v31  ;;  %1345 = vmatpush.xpose.msra.mxu0 %v297_v32  ;;  %v316_v21 = vld [vmem:[%s4016_s30 + $0x158] sm:$0xff]  ;;  %v314_v22 = vld [vmem:[%s4016_s30 + $0x148] sm:$0xff]  ;;  %v447_v23 = vld [vmem:[%s4016_s30 + $0x570] sm:$0x3] }
  0x77   : > { %1405 = vmatpush.xpose.msra.mxu3 %v300_v33  ;;  %1365 = vmatpush.xpose.msra.mxu1 %v298_v34  ;;  %v445_v24 = vld [vmem:[%s4016_s30 + $0x560] sm:$0x3]  ;;  %v448_v25 = vld [vmem:[%s4016_s30 + $0x578] sm:$0x3]  ;;  %v319_v32 = vld [vmem:[%s4016_s30 + $0x170] sm:$0xff] }
  0x78   : > { %v4149_v2 = vld.sshfl [vmem:[#allocation1 + $0x10] sm:$0xff pattern:$0x73625140]  ;;  %v4151_v3 = vld.sshfl [vmem:[#allocation1] sm:$0xff pattern:$0x73625140] }
  0x79   : > { %v4153_v4 = vld.sshfl [vmem:[#allocation1 + $0x18] sm:$0xff pattern:$0x73625140]  ;;  %v4155_v5 = vld.sshfl [vmem:[#allocation1 + $0x8] sm:$0xff pattern:$0x73625140] }
  0x7a   : > { %1464 = vmatpush.xpose.msrb.mxu2 %v431_v35  ;;  %1424 = vmatpush.xpose.msrb.mxu0 %v429_v36  ;;  %622 = vst [vmem:[#allocation1] ss:$4 sm:$0xff] %v253_v1  ;;  %v317_v36 = vld [vmem:[%s4016_s30 + $0x160] sm:$0xff]  ;;  %v320_v39 = vld [vmem:[%s4016_s30 + $0x178] sm:$0xff] }
  0x7b   : > { %1484 = vmatpush.xpose.msrb.mxu3 %v432_v37  ;;  %1444 = vmatpush.xpose.msrb.mxu1 %v430_v38  ;;  %v4158_v7 = vld.sshfl [vmem:[#allocation1 + $0x30] sm:$0xff pattern:$0x73625140]  ;;  %v4160_v8 = vld.sshfl [vmem:[#allocation1 + $0x20] sm:$0xff pattern:$0x73625140] }
  0x7c   : > { %1386 = vmatmul.f32.vlgmr.msra.gmra.mxu2 %v596_v16  ;;  %1346 = vmatmul.f32.vlgmr.msra.gmra.mxu0 %v594_v17  ;;  %v4162_v9 = vld.sshfl [vmem:[#allocation1 + $0x38] sm:$0xff pattern:$0x73625140]  ;;  %v4165_v11 = vld.sshfl [vmem:[#allocation1 + $0x28] sm:$0xff pattern:$0x73625140] }
  0x7d   : > { %1406 = vmatmul.f32.vlgmr.msra.gmra.mxu3 %v4084_v18  ;;  %1366 = vmatmul.f32.vlgmr.msra.gmra.mxu1 %v595_v20  ;;  %623 = vst [vmem:[#allocation1 + $0x20] ss:$4 sm:$0xff] %v254_v12  ;;  %v441_v16 = vld [vmem:[%s4016_s30 + $0x540] sm:$0x3]  ;;  %v444_v17 = vld [vmem:[%s4016_s30 + $0x558] sm:$0x3] }
  0x7e   : > { %1465 = vmatpush.xpose.msrb.mxu2 %v303_v44  ;;  %1425 = vmatpush.xpose.msrb.mxu0 %v301_v48  ;;  %v442_v18 = vld [vmem:[%s4016_s30 + $0x548] sm:$0x3]  ;;  %v313_v20 = vld [vmem:[%s4016_s30 + $0x140] sm:$0xff]  ;;  %v256_v38 = vld [vmem:[%s4010_s5 + $0x78] sm:$0xff] }
  0x7f   : > { %1485 = vmatpush.xpose.msrb.mxu3 %v304_v51  ;;  %1445 = vmatpush.xpose.msrb.mxu1 %v302_v52  ;;  %v450_v44 = vld [vmem:[%s4016_s30 + $0x588] sm:$0x3]  ;;  %v453_v50 = vld [vmem:[%s4016_s30 + $0x5a0] sm:$0x3]  ;;  %v456_v51 = vld [vmem:[%s4016_s30 + $0x5b8] sm:$0x3] }
  0x80   : > { %v322_v48 = vld [vmem:[%s4016_s30 + $0x188] sm:$0xff]  ;;  %v328_v1 = vld [vmem:[%s4016_s30 + $0x1b8] sm:$0xff] }
  0x81   : > { %v4195_v30 = vld.sshfl [vmem:[#allocation1 + $0x18] sm:$0xff pattern:$0x73625140]  ;;  %v4197_v31 = vld.sshfl [vmem:[#allocation1 + $0x8] sm:$0xff pattern:$0x73625140] }
  0x82   : > { %1544 = vmatpush.xpose.msra.mxu2 %v435_v53  ;;  %1504 = vmatpush.xpose.msra.mxu0 %v433_v54  ;;  %v454_v52 = vld [vmem:[%s4016_s30 + $0x5a8] sm:$0x3]  ;;  %v257_v53 = vld [vmem:[%s4010_s5 + $0x80] sm:$0xff] }
  0x83   : > { %1564 = vmatpush.xpose.msra.mxu3 %v436_v55  ;;  %1524 = vmatpush.xpose.msra.mxu1 %v434_v56 }
  0x84   : > { %1466 = vmatmul.f32.vlgmr.msrb.gmra.mxu2 %v4092_v26  ;;  %1426 = vmatmul.f32.vlgmr.msrb.gmra.mxu0 %v4094_v27  ;;  %v446_v26 = vld [vmem:[%s4016_s30 + $0x568] sm:$0x3]  ;;  %v255_v27 = vld [vmem:[%s4010_s5 + $0x70] sm:$0xff]  ;;  %v4202_v34 = vld.sshfl [vmem:[#allocation1 + $0x20] sm:$0xff pattern:$0x73625140] }
  0x85   : > { %1486 = vmatmul.f32.vlgmr.msrb.gmra.mxu3 %v4096_v28  ;;  %1446 = vmatmul.f32.vlgmr.msrb.gmra.mxu1 %v4098_v29  ;;  %v4191_v28 = vld.sshfl [vmem:[#allocation1 + $0x10] sm:$0xff pattern:$0x73625140]  ;;  %v4193_v29 = vld.sshfl [vmem:[#allocation1] sm:$0xff pattern:$0x73625140] }
  0x86   : > { %1545 = vmatpush.xpose.msra.mxu2 %v307_v57  ;;  %1505 = vmatpush.xpose.msra.mxu0 %v305_v58  ;;  %632 = vst [vmem:[#allocation1] ss:$4 sm:$0xff] %v255_v27  ;;  %v4200_v33 = vld.sshfl [vmem:[#allocation1 + $0x30] sm:$0xff pattern:$0x73625140]  ;;  %v327_v58 = vld [vmem:[%s4016_s30 + $0x1b0] sm:$0xff] }
  0x87   : > { %1565 = vmatpush.xpose.msra.mxu3 %v308_v59  ;;  %1525 = vmatpush.xpose.msra.mxu1 %v306_v60  ;;  %v4204_v35 = vld.sshfl [vmem:[#allocation1 + $0x38] sm:$0xff pattern:$0x73625140]  ;;  %v4207_v37 = vld.sshfl [vmem:[#allocation1 + $0x28] sm:$0xff pattern:$0x73625140] }
  0x88   : > { %633 = vst [vmem:[#allocation1 + $0x20] ss:$4 sm:$0xff] %v256_v38  ;;  %v336_v27 = vld [vmem:[%s4016_s30 + $0x1f8] sm:$0xff] }
  0x8a   : > { %1624 = vmatpush.xpose.msrb.mxu2 %v439_v61  ;;  %1584 = vmatpush.xpose.msrb.mxu0 %v437_v62  ;;  %v325_v62 = vld [vmem:[%s4016_s30 + $0x1a0] sm:$0xff] }
  0x8b   : > { %1644 = vmatpush.xpose.msrb.mxu3 %v440_v63  ;;  %1604 = vmatpush.xpose.msrb.mxu1 %v438_v0  ;;  %v258_v0 = vld [vmem:[%s4010_s5 + $0x88] sm:$0xff] }
  0x8c   : > { %1546 = vmatmul.f32.vlgmr.msra.gmra.mxu2 %v4110_v40  ;;  %1506 = vmatmul.f32.vlgmr.msra.gmra.mxu0 %v4112_v41  ;;  %v318_v40 = vld [vmem:[%s4016_s30 + $0x168] sm:$0xff]  ;;  %v451_v41 = vld [vmem:[%s4016_s30 + $0x590] sm:$0x3] }
  0x8d   : > { %1566 = vmatmul.f32.vlgmr.msra.gmra.mxu3 %v4114_v42  ;;  %1526 = vmatmul.f32.vlgmr.msra.gmra.mxu1 %v4116_v43  ;;  %v449_v42 = vld [vmem:[%s4016_s30 + $0x580] sm:$0x3]  ;;  %v452_v43 = vld [vmem:[%s4016_s30 + $0x598] sm:$0x3] }
  0x8e   : > { %1625 = vmatpush.xpose.msrb.mxu2 %v311_v6  ;;  %1585 = vmatpush.xpose.msrb.mxu0 %v309_v10  ;;  %v4233_v54 = vld.sshfl [vmem:[#allocation1 + $0x10] sm:$0xff pattern:$0x73625140]  ;;  %v4235_v55 = vld.sshfl [vmem:[#allocation1] sm:$0xff pattern:$0x73625140] }
  0x8f   : > { %1645 = vmatpush.xpose.msrb.mxu3 %v312_v13  ;;  %1605 = vmatpush.xpose.msrb.mxu1 %v310_v14  ;;  %v4237_v56 = vld.sshfl [vmem:[#allocation1 + $0x18] sm:$0xff pattern:$0x73625140]  ;;  %v4239_v57 = vld.sshfl [vmem:[#allocation1 + $0x8] sm:$0xff pattern:$0x73625140] }
  0x90   : > { %642 = vst [vmem:[#allocation1] ss:$4 sm:$0xff] %v257_v53  ;;  %v4242_v59 = vld.sshfl [vmem:[#allocation1 + $0x30] sm:$0xff pattern:$0x73625140]  ;;  %v259_v13 = vld [vmem:[%s4010_s5 + $0x90] sm:$0xff] }
  0x91   : > { %v4244_v60 = vld.sshfl [vmem:[#allocation1 + $0x20] sm:$0xff pattern:$0x73625140]  ;;  %v4246_v61 = vld.sshfl [vmem:[#allocation1 + $0x38] sm:$0xff pattern:$0x73625140] }
  0x92   : > { %1704 = vmatpush.xpose.msra.mxu2 %v443_v15  ;;  %1664 = vmatpush.xpose.msra.mxu0 %v441_v16  ;;  %v4249_v63 = vld.sshfl [vmem:[#allocation1 + $0x28] sm:$0xff pattern:$0x73625140]  ;;  %v458_v6 = vld [vmem:[%s4016_s30 + $0x5c8] sm:$0x3]  ;;  %v332_v14 = vld [vmem:[%s4016_s30 + $0x1d8] sm:$0xff] }
  0x93   : > { %1724 = vmatpush.xpose.msra.mxu3 %v444_v17  ;;  %1684 = vmatpush.xpose.msra.mxu1 %v442_v18  ;;  %643 = vst [vmem:[#allocation1 + $0x20] ss:$4 sm:$0xff] %v258_v0  ;;  %v330_v15 = vld [vmem:[%s4016_s30 + $0x1c8] sm:$0xff]  ;;  %v463_v16 = vld [vmem:[%s4016_s30 + $0x5f0] sm:$0x3] }
  0x94   : > { %1626 = vmatmul.f32.vlgmr.msrb.gmra.mxu2 %v4119_v45  ;;  %1586 = vmatmul.f32.vlgmr.msrb.gmra.mxu0 %v4121_v46  ;;  %v323_v45 = vld [vmem:[%s4016_s30 + $0x190] sm:$0xff]  ;;  %v321_v46 = vld [vmem:[%s4016_s30 + $0x180] sm:$0xff]  ;;  %v464_v18 = vld [vmem:[%s4016_s30 + $0x5f8] sm:$0x3] }
  0x95   : > { %1646 = vmatmul.f32.vlgmr.msrb.gmra.mxu3 %v4123_v47  ;;  %1606 = vmatmul.f32.vlgmr.msrb.gmra.mxu1 %v4126_v49  ;;  %v324_v47 = vld [vmem:[%s4016_s30 + $0x198] sm:$0xff]  ;;  %v455_v49 = vld [vmem:[%s4016_s30 + $0x5b0] sm:$0x3]  ;;  %v461_v17 = vld [vmem:[%s4016_s30 + $0x5e0] sm:$0x3] }
  0x96   : > { %1705 = vmatpush.xpose.msra.mxu2 %v315_v19  ;;  %1665 = vmatpush.xpose.msra.mxu0 %v313_v20  ;;  %v462_v19 = vld [vmem:[%s4016_s30 + $0x5e8] sm:$0x3]  ;;  %v335_v20 = vld [vmem:[%s4016_s30 + $0x1f0] sm:$0xff] }
  0x97   : > { %1725 = vmatpush.xpose.msra.mxu3 %v316_v21  ;;  %1685 = vmatpush.xpose.msra.mxu1 %v314_v22  ;;  %v4267_v10 = vld.sshfl [vmem:[#allocation1 + $0x18] sm:$0xff pattern:$0x73625140]  ;;  %v4270_v12 = vld.sshfl [vmem:[#allocation1 + $0x8] sm:$0xff pattern:$0x73625140] }
  0x9a   : > { %1784 = vmatpush.xpose.msrb.mxu2 %v447_v23  ;;  %1744 = vmatpush.xpose.msrb.mxu0 %v445_v24  ;;  %v4284_v21 = vld.sshfl [vmem:[#allocation1 + $0x30] sm:$0xff pattern:$0x73625140]  ;;  %v4286_v22 = vld.sshfl [vmem:[#allocation1 + $0x20] sm:$0xff pattern:$0x73625140] }
  0x9b   : > { %1804 = vmatpush.xpose.msrb.mxu3 %v448_v25  ;;  %1764 = vmatpush.xpose.msrb.mxu1 %v446_v26  ;;  %v4288_v23 = vld.sshfl [vmem:[#allocation1 + $0x38] sm:$0xff pattern:$0x73625140]  ;;  %v333_v24 = vld [vmem:[%s4016_s30 + $0x1e0] sm:$0xff]  ;;  %v260_v26 = vld [vmem:[%s4010_s5 + $0x98] sm:$0xff] }
  0x9c   : > { %1706 = vmatmul.f32.vlgmr.msra.gmra.mxu2 %v4149_v2  ;;  %1666 = vmatmul.f32.vlgmr.msra.gmra.mxu0 %v4151_v3  ;;  %v326_v2 = vld [vmem:[%s4016_s30 + $0x1a8] sm:$0xff]  ;;  %v459_v3 = vld [vmem:[%s4016_s30 + $0x5d0] sm:$0x3]  ;;  %v4291_v25 = vld.sshfl [vmem:[#allocation1 + $0x28] sm:$0xff pattern:$0x73625140] }
  0x9d   : > { %1726 = vmatmul.f32.vlgmr.msra.gmra.mxu3 %v4153_v4  ;;  %1686 = vmatmul.f32.vlgmr.msra.gmra.mxu1 %v4155_v5  ;;  %v457_v4 = vld [vmem:[%s4016_s30 + $0x5c0] sm:$0x3]  ;;  %v460_v5 = vld [vmem:[%s4016_s30 + $0x5d8] sm:$0x3]  ;;  %653 = vst [vmem:[#allocation1 + $0x20] ss:$4 sm:$0xff] %v260_v26 }
  0x9e   : > { %1785 = vmatpush.xpose.msrb.mxu2 %v319_v32  ;;  %1745 = vmatpush.xpose.msrb.mxu0 %v317_v36  ;;  %v466_v32 = vld [vmem:[%s4016_s30 + $0x608] sm:$0x3] }
  0x9f   : > { %1805 = vmatpush.xpose.msrb.mxu3 %v320_v39  ;;  %1765 = vmatpush.xpose.msrb.mxu1 %v318_v40  ;;  %v261_v39 = vld [vmem:[%s4010_s5 + $0xa0] sm:$0xff]  ;;  %v340_v40 = vld [vmem:[%s4016_s30 + $0x218] sm:$0xff] }
  0xa2   : > { %1864 = vmatpush.xpose.msra.mxu2 %v451_v41  ;;  %1824 = vmatpush.xpose.msra.mxu0 %v449_v42  ;;  %v338_v41 = vld [vmem:[%s4016_s30 + $0x208] sm:$0xff]  ;;  %v471_v42 = vld [vmem:[%s4016_s30 + $0x630] sm:$0x3] }
  0xa3   : > { %1884 = vmatpush.xpose.msra.mxu3 %v452_v43  ;;  %1844 = vmatpush.xpose.msra.mxu1 %v450_v44  ;;  %v469_v43 = vld [vmem:[%s4016_s30 + $0x620] sm:$0x3]  ;;  %v472_v44 = vld [vmem:[%s4016_s30 + $0x638] sm:$0x3] }
  0xa4   : > { %1786 = vmatmul.f32.vlgmr.msrb.gmra.mxu2 %v4158_v7  ;;  %1746 = vmatmul.f32.vlgmr.msrb.gmra.mxu0 %v4160_v8  ;;  %v331_v7 = vld [vmem:[%s4016_s30 + $0x1d0] sm:$0xff]  ;;  %v4263_v8 = vld.sshfl [vmem:[#allocation1 + $0x10] sm:$0xff pattern:$0x73625140] }
  0xa5   : > { %1806 = vmatmul.f32.vlgmr.msrb.gmra.mxu3 %v4162_v9  ;;  %1766 = vmatmul.f32.vlgmr.msrb.gmra.mxu1 %v4165_v11  ;;  %v4265_v9 = vld.sshfl [vmem:[#allocation1] sm:$0xff pattern:$0x73625140]  ;;  %v329_v11 = vld [vmem:[%s4016_s30 + $0x1c0] sm:$0xff] }
  0xa6   : > { %1865 = vmatpush.xpose.msra.mxu2 %v323_v45  ;;  %1825 = vmatpush.xpose.msra.mxu0 %v321_v46  ;;  %652 = vst [vmem:[#allocation1] ss:$4 sm:$0xff] %v259_v13  ;;  %v470_v45 = vld [vmem:[%s4016_s30 + $0x628] sm:$0x3] }
  0xa7   : > { %1885 = vmatpush.xpose.msra.mxu3 %v324_v47  ;;  %1845 = vmatpush.xpose.msra.mxu1 %v322_v48  ;;  %v343_v47 = vld [vmem:[%s4016_s30 + $0x230] sm:$0xff]  ;;  %v4326_v48 = vld.sshfl [vmem:[#allocation1 + $0x30] sm:$0xff pattern:$0x73625140] }
  0xa8   : > { %v4333_v53 = vld.sshfl [vmem:[#allocation1 + $0x28] sm:$0xff pattern:$0x73625140]  ;;  %v346_v13 = vld [vmem:[%s4016_s30 + $0x248] sm:$0xff] }
  0xaa   : > { %1944 = vmatpush.xpose.msrb.mxu2 %v455_v49  ;;  %1904 = vmatpush.xpose.msrb.mxu0 %v453_v50  ;;  %v4328_v50 = vld.sshfl [vmem:[#allocation1 + $0x20] sm:$0xff pattern:$0x73625140] }
  0xab   : > { %1964 = vmatpush.xpose.msrb.mxu3 %v456_v51  ;;  %1924 = vmatpush.xpose.msrb.mxu1 %v454_v52  ;;  %v4330_v51 = vld.sshfl [vmem:[#allocation1 + $0x38] sm:$0xff pattern:$0x73625140]  ;;  %v341_v52 = vld [vmem:[%s4016_s30 + $0x220] sm:$0xff] }
  0xac   : > { %1866 = vmatmul.f32.vlgmr.msra.gmra.mxu2 %v4191_v28  ;;  %1826 = vmatmul.f32.vlgmr.msra.gmra.mxu0 %v4193_v29  ;;  %v334_v28 = vld [vmem:[%s4016_s30 + $0x1e8] sm:$0xff]  ;;  %v467_v29 = vld [vmem:[%s4016_s30 + $0x610] sm:$0x3] }
  0xad   : > { %1886 = vmatmul.f32.vlgmr.msra.gmra.mxu3 %v4195_v30  ;;  %1846 = vmatmul.f32.vlgmr.msra.gmra.mxu1 %v4197_v31  ;;  %v465_v30 = vld [vmem:[%s4016_s30 + $0x600] sm:$0x3]  ;;  %v468_v31 = vld [vmem:[%s4016_s30 + $0x618] sm:$0x3] }
  0xae   : > { %1945 = vmatpush.xpose.msrb.mxu2 %v327_v58  ;;  %1905 = vmatpush.xpose.msrb.mxu0 %v325_v62  ;;  %v4309_v36 = vld.sshfl [vmem:[#allocation1 + $0x18] sm:$0xff pattern:$0x73625140]  ;;  %v4312_v38 = vld.sshfl [vmem:[#allocation1 + $0x8] sm:$0xff pattern:$0x73625140] }
  0xaf   : > { %1965 = vmatpush.xpose.msrb.mxu3 %v328_v1  ;;  %1925 = vmatpush.xpose.msrb.mxu1 %v326_v2  ;;  %v473_v58 = vld [vmem:[%s4016_s30 + $0x640] sm:$0x3]  ;;  %v347_v2 = vld [vmem:[%s4016_s30 + $0x250] sm:$0xff] }
  0xb2   : > { %2024 = vmatpush.xpose.msra.mxu2 %v459_v3  ;;  %1984 = vmatpush.xpose.msra.mxu0 %v457_v4 }
  0xb3   : > { %2044 = vmatpush.xpose.msra.mxu3 %v460_v5  ;;  %2004 = vmatpush.xpose.msra.mxu1 %v458_v6 }
  0xb4   : > { %1946 = vmatmul.f32.vlgmr.msrb.gmra.mxu2 %v4200_v33  ;;  %1906 = vmatmul.f32.vlgmr.msrb.gmra.mxu0 %v4202_v34  ;;  %v339_v33 = vld [vmem:[%s4016_s30 + $0x210] sm:$0xff]  ;;  %v4305_v34 = vld.sshfl [vmem:[#allocation1 + $0x10] sm:$0xff pattern:$0x73625140] }
  0xb5   : > { %1966 = vmatmul.f32.vlgmr.msrb.gmra.mxu3 %v4204_v35  ;;  %1926 = vmatmul.f32.vlgmr.msrb.gmra.mxu1 %v4207_v37  ;;  %v4307_v35 = vld.sshfl [vmem:[#allocation1] sm:$0xff pattern:$0x73625140]  ;;  %v337_v37 = vld [vmem:[%s4016_s30 + $0x200] sm:$0xff] }
  0xb6   : > { %2025 = vmatpush.xpose.msra.mxu2 %v331_v7  ;;  %1985 = vmatpush.xpose.msra.mxu0 %v329_v11  ;;  %662 = vst [vmem:[#allocation1] ss:$4 sm:$0xff] %v261_v39  ;;  %v483_v39 = vld [vmem:[%s4016_s30 + $0x690] sm:$0x3] }
  0xb7   : > { %2045 = vmatpush.xpose.msra.mxu3 %v332_v14  ;;  %2005 = vmatpush.xpose.msra.mxu1 %v330_v15  ;;  %v479_v14 = vld [vmem:[%s4016_s30 + $0x670] sm:$0x3]  ;;  %v477_v15 = vld [vmem:[%s4016_s30 + $0x660] sm:$0x3] }
  0xba   : > { %2104 = vmatpush.xpose.msrb.mxu2 %v463_v16  ;;  %2064 = vmatpush.xpose.msrb.mxu0 %v461_v17  ;;  %v480_v17 = vld [vmem:[%s4016_s30 + $0x678] sm:$0x3] }
  0xbb   : > { %2124 = vmatpush.xpose.msrb.mxu3 %v464_v18  ;;  %2084 = vmatpush.xpose.msrb.mxu1 %v462_v19  ;;  %v478_v18 = vld [vmem:[%s4016_s30 + $0x668] sm:$0x3] }
  0xbc   : > { %2026 = vmatmul.f32.vlgmr.msra.gmra.mxu2 %v4233_v54  ;;  %1986 = vmatmul.f32.vlgmr.msra.gmra.mxu0 %v4235_v55  ;;  %v262_v54 = vld [vmem:[%s4010_s5 + $0xa8] sm:$0xff]  ;;  %v344_v55 = vld [vmem:[%s4016_s30 + $0x238] sm:$0xff] }
  0xbd   : > { %2046 = vmatmul.f32.vlgmr.msra.gmra.mxu3 %v4237_v56  ;;  %2006 = vmatmul.f32.vlgmr.msra.gmra.mxu1 %v4239_v57  ;;  %v342_v56 = vld [vmem:[%s4016_s30 + $0x228] sm:$0xff]  ;;  %663 = vst [vmem:[#allocation1 + $0x20] ss:$4 sm:$0xff] %v262_v54  ;;  %v475_v57 = vld [vmem:[%s4016_s30 + $0x650] sm:$0x3]  ;;  %v353_v54 = vld [vmem:[%s4016_s30 + $0x280] sm:$0xff] }
  0xbe   : > { %2105 = vmatpush.xpose.msrb.mxu2 %v335_v20  ;;  %2065 = vmatpush.xpose.msrb.mxu0 %v333_v24  ;;  %v4347_v3 = vld.sshfl [vmem:[#allocation1 + $0x10] sm:$0xff pattern:$0x73625140]  ;;  %v4349_v6 = vld.sshfl [vmem:[#allocation1] sm:$0xff pattern:$0x73625140] }
  0xbf   : > { %2125 = vmatpush.xpose.msrb.mxu3 %v336_v27  ;;  %2085 = vmatpush.xpose.msrb.mxu1 %v334_v28  ;;  %v4351_v7 = vld.sshfl [vmem:[#allocation1 + $0x18] sm:$0xff pattern:$0x73625140] }
  0xc2   : > { %2184 = vmatpush.xpose.msra.mxu2 %v467_v29  ;;  %2144 = vmatpush.xpose.msra.mxu0 %v465_v30  ;;  %v349_v29 = vld [vmem:[%s4016_s30 + $0x260] sm:$0xff] }
  0xc3   : > { %2204 = vmatpush.xpose.msra.mxu3 %v468_v31  ;;  %2164 = vmatpush.xpose.msra.mxu1 %v466_v32  ;;  %v264_v31 = vld [vmem:[%s4010_s5 + $0xb8] sm:$0xff] }
  0xc4   : > { %2106 = vmatmul.f32.vlgmr.msrb.gmra.mxu2 %v4242_v59  ;;  %2066 = vmatmul.f32.vlgmr.msrb.gmra.mxu0 %v4244_v60  ;;  %v476_v60 = vld [vmem:[%s4016_s30 + $0x658] sm:$0x3]  ;;  %v4368_v24 = vld.sshfl [vmem:[#allocation1 + $0x30] sm:$0xff pattern:$0x73625140] }
  0xc5   : > { %2126 = vmatmul.f32.vlgmr.msrb.gmra.mxu3 %v4246_v61  ;;  %2086 = vmatmul.f32.vlgmr.msrb.gmra.mxu1 %v4249_v63  ;;  %v474_v61 = vld [vmem:[%s4016_s30 + $0x648] sm:$0x3]  ;;  %v4370_v27 = vld.sshfl [vmem:[#allocation1 + $0x20] sm:$0xff pattern:$0x73625140] }
  0xc6   : > { %2185 = vmatpush.xpose.msra.mxu2 %v339_v33  ;;  %2145 = vmatpush.xpose.msra.mxu0 %v337_v37  ;;  %v4372_v28 = vld.sshfl [vmem:[#allocation1 + $0x38] sm:$0xff pattern:$0x73625140]  ;;  %v4375_v30 = vld.sshfl [vmem:[#allocation1 + $0x28] sm:$0xff pattern:$0x73625140] }
  0xc7   : > { %2205 = vmatpush.xpose.msra.mxu3 %v340_v40  ;;  %2165 = vmatpush.xpose.msra.mxu1 %v338_v41  ;;  %v352_v33 = vld [vmem:[%s4016_s30 + $0x278] sm:$0xff]  ;;  %v350_v37 = vld [vmem:[%s4016_s30 + $0x268] sm:$0xff]  ;;  %673 = vst [vmem:[#allocation1 + $0x20] ss:$4 sm:$0xff] %v264_v31  ;;  %v481_v40 = vld [vmem:[%s4016_s30 + $0x680] sm:$0x3] }
  0xc9   : > { %v867_v46 = vpop.f32.mrf.mxu0 }
  0xca   : > { %2264 = vmatpush.xpose.msrb.mxu2 %v471_v42  ;;  %2224 = vmatpush.xpose.msrb.mxu0 %v469_v43  ;;  %v887_v49 = vpop.f32.mrf.mxu1  ;;  %v484_v42 = vld [vmem:[%s4016_s30 + $0x698] sm:$0x3]  ;;  %v482_v43 = vld [vmem:[%s4016_s30 + $0x688] sm:$0x3] }
  0xcb   : > { %2284 = vmatpush.xpose.msrb.mxu3 %v472_v44  ;;  %2244 = vmatpush.xpose.msrb.mxu1 %v470_v45  ;;  %v888_v59 = vadd.f32 %v887_v49, %v867_v46 }
  0xcc   : > { %2186 = vmatmul.f32.vlgmr.msra.gmra.mxu2 %v4263_v8  ;;  %2146 = vmatmul.f32.vlgmr.msra.gmra.mxu0 %v4265_v9  ;;  %v345_v8 = vld [vmem:[%s4016_s30 + $0x240] sm:$0xff] }
  0xcd   : > { %2206 = vmatmul.f32.vlgmr.msra.gmra.mxu3 %v4267_v10  ;;  %2166 = vmatmul.f32.vlgmr.msra.gmra.mxu1 %v4270_v12  ;;  %v4354_v9 = vld.sshfl [vmem:[#allocation1 + $0x8] sm:$0xff pattern:$0x73625140]  ;;  %v263_v10 = vld [vmem:[%s4010_s5 + $0xb0] sm:$0xff]  ;;  %v348_v12 = vld [vmem:[%s4016_s30 + $0x258] sm:$0xff] }
  0xce   : > { %2265 = vmatpush.xpose.msrb.mxu2 %v343_v47  ;;  %2225 = vmatpush.xpose.msrb.mxu0 %v341_v52  ;;  %672 = vst [vmem:[#allocation1] ss:$4 sm:$0xff] %v263_v10  ;;  %v4414_v10 = vld.sshfl [vmem:[#allocation1 + $0x38] sm:$0xff pattern:$0x73625140] }
  0xcf   : > { %v907_v62 = vpop.f32.mrf.mxu2  ;;  %2285 = vmatpush.xpose.msrb.mxu3 %v344_v55  ;;  %2245 = vmatpush.xpose.msrb.mxu1 %v342_v56  ;;  %v265_v56 = vld [vmem:[%s4010_s5 + $0xc0] sm:$0xff] }
  0xd0   : > { %v908_v63 = vadd.f32 %v907_v62, %v888_v59  ;;  %v927_v0 = vpop.f32.mrf.mxu3  ;;  %v354_v59 = vld [vmem:[%s4016_s30 + $0x288] sm:$0xff] }
  0xd1   : > { %v947_v1 = vpop.f32.mrf.mxu0 }
  0xd2   : > { %2344 = vmatpush.xpose.msra.mxu2 %v475_v57  ;;  %2304 = vmatpush.xpose.msra.mxu0 %v473_v58  ;;  %v928_v4 = vadd.f32 %v927_v0, %v908_v63  ;;  %v967_v5 = vpop.f32.mrf.mxu1  ;;  %v356_v58 = vld [vmem:[%s4016_s30 + $0x298] sm:$0xff]  ;;  %v486_v0 = vld [vmem:[%s4016_s30 + $0x6a8] sm:$0x3] }
  0xd3   : > { %2364 = vmatpush.xpose.msra.mxu3 %v476_v60  ;;  %2324 = vmatpush.xpose.msra.mxu1 %v474_v61  ;;  %v487_v60 = vld [vmem:[%s4016_s30 + $0x6b0] sm:$0x3]  ;;  %v485_v61 = vld [vmem:[%s4016_s30 + $0x6a0] sm:$0x3]  ;;  %v488_v63 = vld [vmem:[%s4016_s30 + $0x6b8] sm:$0x3] }
  0xd4   : > { %v948_v11 = vadd.f32 %v947_v1, %v928_v4  ;;  %2266 = vmatmul.f32.vlgmr.msrb.gmra.mxu2 %v4284_v21  ;;  %2226 = vmatmul.f32.vlgmr.msrb.gmra.mxu0 %v4286_v22 }
  0xd5   : > { %2286 = vmatmul.f32.vlgmr.msrb.gmra.mxu3 %v4288_v23  ;;  %2246 = vmatmul.f32.vlgmr.msrb.gmra.mxu1 %v4291_v25  ;;  %v351_v23 = vld [vmem:[%s4016_s30 + $0x270] sm:$0xff]  ;;  %v4389_v45 = vld.sshfl [vmem:[#allocation1 + $0x10] sm:$0xff pattern:$0x73625140] }
  0xd6   : > { %v968_v16 = vadd.f32 %v967_v5, %v948_v11  ;;  %2345 = vmatpush.xpose.msra.mxu2 %v347_v2  ;;  %2305 = vmatpush.xpose.msra.mxu0 %v345_v8  ;;  %v4391_v49 = vld.sshfl [vmem:[#allocation1] sm:$0xff pattern:$0x73625140]  ;;  %v4393_v52 = vld.sshfl [vmem:[#allocation1 + $0x18] sm:$0xff pattern:$0x73625140] }
  0xd7   : > { %v987_v19 = vpop.f32.mrf.mxu2  ;;  %2365 = vmatpush.xpose.msra.mxu3 %v348_v12  ;;  %2325 = vmatpush.xpose.msra.mxu1 %v346_v13  ;;  %v4396_v55 = vld.sshfl [vmem:[#allocation1 + $0x8] sm:$0xff pattern:$0x73625140]  ;;  %v4410_v2 = vld.sshfl [vmem:[#allocation1 + $0x30] sm:$0xff pattern:$0x73625140] }
  0xd8   : > { %v988_v20 = vadd.f32 %v987_v19, %v968_v16  ;;  %v1007_v21 = vpop.f32.mrf.mxu3  ;;  %682 = vst [vmem:[#allocation1] ss:$4 sm:$0xff] %v265_v56  ;;  %v4412_v8 = vld.sshfl [vmem:[#allocation1 + $0x20] sm:$0xff pattern:$0x73625140]  ;;  %v357_v11 = vld [vmem:[%s4016_s30 + $0x2a0] sm:$0xff] }
  0xd9   : > { %v1027_v22 = vpop.f32.mrf.mxu0  ;;  %v4417_v12 = vld.sshfl [vmem:[#allocation1 + $0x28] sm:$0xff pattern:$0x73625140]  ;;  %v266_v13 = vld [vmem:[%s4010_s5 + $0xc8] sm:$0xff] }
  0xda   : > { %2424 = vmatpush.xpose.msrb.mxu2 %v479_v14  ;;  %2384 = vmatpush.xpose.msrb.mxu0 %v477_v15  ;;  %v1008_v25 = vadd.f32 %v1007_v21, %v988_v20  ;;  %v1047_v26 = vpop.f32.mrf.mxu1  ;;  %v360_v15 = vld [vmem:[%s4016_s30 + $0x2b8] sm:$0xff]  ;;  %v358_v16 = vld [vmem:[%s4016_s30 + $0x2a8] sm:$0xff]  ;;  %683 = vst [vmem:[#allocation1 + $0x20] ss:$4 sm:$0xff] %v266_v13 }
  0xdb   : > { %2444 = vmatpush.xpose.msrb.mxu3 %v480_v17  ;;  %2404 = vmatpush.xpose.msrb.mxu1 %v478_v18  ;;  %v491_v17 = vld [vmem:[%s4016_s30 + $0x6d0] sm:$0x3]  ;;  %v489_v18 = vld [vmem:[%s4016_s30 + $0x6c0] sm:$0x3]  ;;  %v492_v20 = vld [vmem:[%s4016_s30 + $0x6d8] sm:$0x3] }
  0xdc   : > { %v1028_v32 = vadd.f32 %v1027_v22, %v1008_v25  ;;  %2346 = vmatmul.f32.vlgmr.msra.gmra.mxu2 %v4305_v34  ;;  %2306 = vmatmul.f32.vlgmr.msra.gmra.mxu0 %v4307_v35  ;;  %v490_v21 = vld [vmem:[%s4016_s30 + $0x6c8] sm:$0x3] }
  0xdd   : > { %2366 = vmatmul.f32.vlgmr.msra.gmra.mxu3 %v4309_v36  ;;  %2326 = vmatmul.f32.vlgmr.msra.gmra.mxu1 %v4312_v38  ;;  %v355_v38 = vld [vmem:[%s4016_s30 + $0x290] sm:$0xff] }
  0xde   : > { %v1048_v41 = vadd.f32 %v1047_v26, %v1028_v32  ;;  %2425 = vmatpush.xpose.msrb.mxu2 %v351_v23  ;;  %2385 = vmatpush.xpose.msrb.mxu0 %v349_v29  ;;  %v361_v32 = vld [vmem:[%s4016_s30 + $0x2c0] sm:$0xff] }
  0xdf   : > { %v1067_v44 = vpop.f32.mrf.mxu2  ;;  %2445 = vmatpush.xpose.msrb.mxu3 %v352_v33  ;;  %2405 = vmatpush.xpose.msrb.mxu1 %v350_v37  ;;  %v4431_v23 = vld.sshfl [vmem:[#allocation1 + $0x10] sm:$0xff pattern:$0x73625140]  ;;  %v4433_v29 = vld.sshfl [vmem:[#allocation1] sm:$0xff pattern:$0x73625140] }
  0xe0   : > { %v1068_v34 = vadd.f32 %v1067_v44, %v1048_v41  ;;  %v1087_v35 = vpop.f32.mrf.mxu3  ;;  %v4435_v31 = vld.sshfl [vmem:[#allocation1 + $0x18] sm:$0xff pattern:$0x73625140]  ;;  %v4438_v33 = vld.sshfl [vmem:[#allocation1 + $0x8] sm:$0xff pattern:$0x73625140] }
  0xe1   : > { %v1107_v36 = vpop.f32.mrf.mxu0  ;;  %v267_v37 = vld [vmem:[%s4010_s5 + $0xd0] sm:$0xff]  ;;  %v362_v41 = vld [vmem:[%s4016_s30 + $0x2c8] sm:$0xff] }
  0xe2   : > { %2504 = vmatpush.xpose.msra.mxu2 %v483_v39  ;;  %2464 = vmatpush.xpose.msra.mxu0 %v481_v40  ;;  %v1088_v46 = vadd.f32 %v1087_v35, %v1068_v34  ;;  %v1127_v47 = vpop.f32.mrf.mxu1  ;;  %v364_v40 = vld [vmem:[%s4016_s30 + $0x2d8] sm:$0xff]  ;;  %692 = vst [vmem:[#allocation1] ss:$4 sm:$0xff] %v267_v37  ;;  %v494_v35 = vld [vmem:[%s4016_s30 + $0x6e8] sm:$0x3] }
  0xe3   : > { %2524 = vmatpush.xpose.msra.mxu3 %v484_v42  ;;  %2484 = vmatpush.xpose.msra.mxu1 %v482_v43  ;;  %v495_v42 = vld [vmem:[%s4016_s30 + $0x6f0] sm:$0x3]  ;;  %v493_v43 = vld [vmem:[%s4016_s30 + $0x6e0] sm:$0x3]  ;;  %v496_v34 = vld [vmem:[%s4016_s30 + $0x6f8] sm:$0x3] }
  0xe4   : > { %v1108_v57 = vadd.f32 %v1107_v36, %v1088_v46  ;;  %2426 = vmatmul.f32.vlgmr.msrb.gmra.mxu2 %v4326_v48  ;;  %2386 = vmatmul.f32.vlgmr.msrb.gmra.mxu0 %v4328_v50  ;;  %v4456_v56 = vld.sshfl [vmem:[#allocation1 + $0x38] sm:$0xff pattern:$0x73625140] }
  0xe5   : > { %2446 = vmatmul.f32.vlgmr.msrb.gmra.mxu3 %v4330_v51  ;;  %2406 = vmatmul.f32.vlgmr.msrb.gmra.mxu1 %v4333_v53  ;;  %v359_v53 = vld [vmem:[%s4016_s30 + $0x2b0] sm:$0xff] }
  0xe6   : > { %v1128_v62 = vadd.f32 %v1127_v47, %v1108_v57  ;;  %2505 = vmatpush.xpose.msra.mxu2 %v355_v38  ;;  %2465 = vmatpush.xpose.msra.mxu0 %v353_v54  ;;  %v4452_v38 = vld.sshfl [vmem:[#allocation1 + $0x30] sm:$0xff pattern:$0x73625140]  ;;  %v4454_v54 = vld.sshfl [vmem:[#allocation1 + $0x20] sm:$0xff pattern:$0x73625140] }
  0xe7   : > { %v1147_v1 = vpop.f32.mrf.mxu2  ;;  %2525 = vmatpush.xpose.msra.mxu3 %v356_v58  ;;  %2485 = vmatpush.xpose.msra.mxu1 %v354_v59  ;;  %v365_v57 = vld [vmem:[%s4016_s30 + $0x2e0] sm:$0xff]  ;;  %v268_v59 = vld [vmem:[%s4010_s5 + $0xd8] sm:$0xff] }
  0xe8   : > { %v1148_v48 = vadd.f32 %v1147_v1, %v1128_v62  ;;  %v1167_v50 = vpop.f32.mrf.mxu3  ;;  %v4459_v58 = vld.sshfl [vmem:[#allocation1 + $0x28] sm:$0xff pattern:$0x73625140]  ;;  %v366_v62 = vld [vmem:[%s4016_s30 + $0x2e8] sm:$0xff] }
  0xe9   : > { %v1187_v51 = vpop.f32.mrf.mxu0  ;;  %693 = vst [vmem:[#allocation1 + $0x20] ss:$4 sm:$0xff] %v268_v59  ;;  %v4477_v13 = vld.sshfl [vmem:[#allocation1 + $0x18] sm:$0xff pattern:$0x73625140] }
  0xea   : > { %2584 = vmatpush.xpose.msrb.mxu2 %v487_v60  ;;  %2544 = vmatpush.xpose.msrb.mxu0 %v485_v61  ;;  %v1168_v4 = vadd.f32 %v1167_v50, %v1148_v48  ;;  %v1207_v5 = vpop.f32.mrf.mxu1  ;;  %v368_v61 = vld [vmem:[%s4016_s30 + $0x2f8] sm:$0xff]  ;;  %v498_v50 = vld [vmem:[%s4016_s30 + $0x708] sm:$0x3] }
  0xeb   : > { %2604 = vmatpush.xpose.msrb.mxu3 %v488_v63  ;;  %2564 = vmatpush.xpose.msrb.mxu1 %v486_v0  ;;  %v499_v63 = vld [vmem:[%s4016_s30 + $0x710] sm:$0x3]  ;;  %v497_v0 = vld [vmem:[%s4016_s30 + $0x700] sm:$0x3]  ;;  %v500_v48 = vld [vmem:[%s4016_s30 + $0x718] sm:$0x3] }
  0xec   : > { %v1188_v14 = vadd.f32 %v1187_v51, %v1168_v4  ;;  %2506 = vmatmul.f32.vlgmr.msra.gmra.mxu2 %v4347_v3  ;;  %2466 = vmatmul.f32.vlgmr.msra.gmra.mxu0 %v4349_v6 }
  0xed   : > { %2526 = vmatmul.f32.vlgmr.msra.gmra.mxu3 %v4351_v7  ;;  %2486 = vmatmul.f32.vlgmr.msra.gmra.mxu1 %v4354_v9  ;;  %v363_v9 = vld [vmem:[%s4016_s30 + $0x2d0] sm:$0xff] }
  0xee   : > { %v1208_v19 = vadd.f32 %v1207_v5, %v1188_v14  ;;  %2585 = vmatpush.xpose.msrb.mxu2 %v359_v53  ;;  %2545 = vmatpush.xpose.msrb.mxu0 %v357_v11  ;;  %v4473_v53 = vld.sshfl [vmem:[#allocation1 + $0x10] sm:$0xff pattern:$0x73625140]  ;;  %v4475_v11 = vld.sshfl [vmem:[#allocation1] sm:$0xff pattern:$0x73625140] }
  0xef   : > { %v1227_v22 = vpop.f32.mrf.mxu2  ;;  %2605 = vmatpush.xpose.msrb.mxu3 %v360_v15  ;;  %2565 = vmatpush.xpose.msrb.mxu1 %v358_v16  ;;  %v369_v14 = vld [vmem:[%s4016_s30 + $0x300] sm:$0xff] }
  0xf0   : > { %v1228_v3 = vadd.f32 %v1227_v22, %v1208_v19  ;;  %v1247_v6 = vpop.f32.mrf.mxu3  ;;  %v4480_v15 = vld.sshfl [vmem:[#allocation1 + $0x8] sm:$0xff pattern:$0x73625140]  ;;  %v370_v19 = vld [vmem:[%s4016_s30 + $0x308] sm:$0xff] }
  0xf1   : > { %v1267_v7 = vpop.f32.mrf.mxu0  ;;  %v269_v16 = vld [vmem:[%s4010_s5 + $0xe0] sm:$0xff]  ;;  %v4498_v37 = vld.sshfl [vmem:[#allocation1 + $0x38] sm:$0xff pattern:$0x73625140] }
  0xf2   : > { %2664 = vmatpush.xpose.msra.mxu2 %v491_v17  ;;  %2624 = vmatpush.xpose.msra.mxu0 %v489_v18  ;;  %v1248_v25 = vadd.f32 %v1247_v6, %v1228_v3  ;;  %v1287_v26 = vpop.f32.mrf.mxu1  ;;  %v372_v18 = vld [vmem:[%s4016_s30 + $0x318] sm:$0xff]  ;;  %702 = vst [vmem:[#allocation1] ss:$4 sm:$0xff] %v269_v16  ;;  %v502_v6 = vld [vmem:[%s4016_s30 + $0x728] sm:$0x3] }
  0xf3   : > { %2684 = vmatpush.xpose.msra.mxu3 %v492_v20  ;;  %2644 = vmatpush.xpose.msra.mxu1 %v490_v21  ;;  %v503_v20 = vld [vmem:[%s4016_s30 + $0x730] sm:$0x3]  ;;  %v501_v21 = vld [vmem:[%s4016_s30 + $0x720] sm:$0x3]  ;;  %v504_v3 = vld [vmem:[%s4016_s30 + $0x738] sm:$0x3] }
  0xf4   : > { %v1268_v39 = vadd.f32 %v1267_v7, %v1248_v25  ;;  %2586 = vmatmul.f32.vlgmr.msrb.gmra.mxu2 %v4368_v24  ;;  %2546 = vmatmul.f32.vlgmr.msrb.gmra.mxu0 %v4370_v27 }
  0xf5   : > { %2606 = vmatmul.f32.vlgmr.msrb.gmra.mxu3 %v4372_v28  ;;  %2566 = vmatmul.f32.vlgmr.msrb.gmra.mxu1 %v4375_v30  ;;  %v367_v30 = vld [vmem:[%s4016_s30 + $0x2f0] sm:$0xff] }
  0xf6   : > { %v1288_v44 = vadd.f32 %v1287_v26, %v1268_v39  ;;  %2665 = vmatpush.xpose.msra.mxu2 %v363_v9  ;;  %2625 = vmatpush.xpose.msra.mxu0 %v361_v32  ;;  %v4494_v9 = vld.sshfl [vmem:[#allocation1 + $0x30] sm:$0xff pattern:$0x73625140]  ;;  %v4496_v32 = vld.sshfl [vmem:[#allocation1 + $0x20] sm:$0xff pattern:$0x73625140] }
  0xf7   : > { %v1307_v36 = vpop.f32.mrf.mxu2  ;;  %2685 = vmatpush.xpose.msra.mxu3 %v364_v40  ;;  %2645 = vmatpush.xpose.msra.mxu1 %v362_v41  ;;  %v373_v39 = vld [vmem:[%s4016_s30 + $0x320] sm:$0xff]  ;;  %v270_v41 = vld [vmem:[%s4010_s5 + $0xe8] sm:$0xff] }
  0xf8   : > { %v1308_v24 = vadd.f32 %v1307_v36, %v1288_v44  ;;  %v1327_v27 = vpop.f32.mrf.mxu3  ;;  %v4501_v40 = vld.sshfl [vmem:[#allocation1 + $0x28] sm:$0xff pattern:$0x73625140]  ;;  %v374_v44 = vld [vmem:[%s4016_s30 + $0x328] sm:$0xff] }
  0xf9   : > { %v1347_v28 = vpop.f32.mrf.mxu0  ;;  %703 = vst [vmem:[#allocation1 + $0x20] ss:$4 sm:$0xff] %v270_v41  ;;  %v4519_v59 = vld.sshfl [vmem:[#allocation1 + $0x18] sm:$0xff pattern:$0x73625140]  ;;  %v388_v41 = vld [vmem:[%s4016_s30 + $0x398] sm:$0xff] }
  0xfa   : > { %2744 = vmatpush.xpose.msrb.mxu2 %v495_v42  ;;  %2704 = vmatpush.xpose.msrb.mxu0 %v493_v43  ;;  %v1328_v46 = vadd.f32 %v1327_v27, %v1308_v24  ;;  %v1367_v47 = vpop.f32.mrf.mxu1  ;;  %v376_v43 = vld [vmem:[%s4016_s30 + $0x338] sm:$0xff]  ;;  %v506_v27 = vld [vmem:[%s4016_s30 + $0x748] sm:$0x3] }
  0xfb   : > { %2764 = vmatpush.xpose.msrb.mxu3 %v496_v34  ;;  %2724 = vmatpush.xpose.msrb.mxu1 %v494_v35  ;;  %v507_v34 = vld [vmem:[%s4016_s30 + $0x750] sm:$0x3]  ;;  %v505_v35 = vld [vmem:[%s4016_s30 + $0x740] sm:$0x3]  ;;  %v508_v24 = vld [vmem:[%s4016_s30 + $0x758] sm:$0x3] }
  0xfc   : > { %v1348_v60 = vadd.f32 %v1347_v28, %v1328_v46  ;;  %2666 = vmatmul.f32.vlgmr.msra.gmra.mxu2 %v4389_v45  ;;  %2626 = vmatmul.f32.vlgmr.msra.gmra.mxu0 %v4391_v49 }
  0xfd   : > { %2686 = vmatmul.f32.vlgmr.msra.gmra.mxu3 %v4393_v52  ;;  %2646 = vmatmul.f32.vlgmr.msra.gmra.mxu1 %v4396_v55  ;;  %v371_v55 = vld [vmem:[%s4016_s30 + $0x310] sm:$0xff] }
  0xfe   : > { %v1368_v1 = vadd.f32 %v1367_v47, %v1348_v60  ;;  %2745 = vmatpush.xpose.msrb.mxu2 %v367_v30  ;;  %2705 = vmatpush.xpose.msrb.mxu0 %v365_v57  ;;  %v4515_v30 = vld.sshfl [vmem:[#allocation1 + $0x10] sm:$0xff pattern:$0x73625140]  ;;  %v4517_v57 = vld.sshfl [vmem:[#allocation1] sm:$0xff pattern:$0x73625140] }
  0xff   : > { %v1387_v51 = vpop.f32.mrf.mxu2  ;;  %2765 = vmatpush.xpose.msrb.mxu3 %v368_v61  ;;  %2725 = vmatpush.xpose.msrb.mxu1 %v366_v62  ;;  %v377_v60 = vld [vmem:[%s4016_s30 + $0x340] sm:$0xff]  ;;  %v271_v62 = vld [vmem:[%s4010_s5 + $0xf0] sm:$0xff] }
 0x100   : > { %v1388_v45 = vadd.f32 %v1387_v51, %v1368_v1  ;;  %v1407_v49 = vpop.f32.mrf.mxu3  ;;  %v4522_v61 = vld.sshfl [vmem:[#allocation1 + $0x8] sm:$0xff pattern:$0x73625140]  ;;  %v378_v1 = vld [vmem:[%s4016_s30 + $0x348] sm:$0xff] }
 0x101   : > { %v1427_v52 = vpop.f32.mrf.mxu0  ;;  %712 = vst [vmem:[#allocation1] ss:$4 sm:$0xff] %v271_v62  ;;  %v4540_v16 = vld.sshfl [vmem:[#allocation1 + $0x38] sm:$0xff pattern:$0x73625140] }
 0x102   : > { %2824 = vmatpush.xpose.msra.mxu2 %v499_v63  ;;  %2784 = vmatpush.xpose.msra.mxu0 %v497_v0  ;;  %v1408_v4 = vadd.f32 %v1407_v49, %v1388_v45  ;;  %v1447_v5 = vpop.f32.mrf.mxu1  ;;  %v380_v0 = vld [vmem:[%s4016_s30 + $0x358] sm:$0xff]  ;;  %v510_v49 = vld [vmem:[%s4016_s30 + $0x768] sm:$0x3] }
 0x103   : > { %2844 = vmatpush.xpose.msra.mxu3 %v500_v48  ;;  %2804 = vmatpush.xpose.msra.mxu1 %v498_v50  ;;  %v511_v48 = vld [vmem:[%s4016_s30 + $0x770] sm:$0x3]  ;;  %v509_v50 = vld [vmem:[%s4016_s30 + $0x760] sm:$0x3]  ;;  %v512_v45 = vld [vmem:[%s4016_s30 + $0x778] sm:$0x3] }
 0x104   : > { %v1428_v17 = vadd.f32 %v1427_v52, %v1408_v4  ;;  %2746 = vmatmul.f32.vlgmr.msrb.gmra.mxu2 %v4410_v2  ;;  %2706 = vmatmul.f32.vlgmr.msrb.gmra.mxu0 %v4412_v8  ;;  %v524_v62 = vld [vmem:[%s4016_s30 + $0x7d8] sm:$0x3] }
 0x105   : > { %2766 = vmatmul.f32.vlgmr.msrb.gmra.mxu3 %v4414_v10  ;;  %2726 = vmatmul.f32.vlgmr.msrb.gmra.mxu1 %v4417_v12  ;;  %v375_v12 = vld [vmem:[%s4016_s30 + $0x330] sm:$0xff] }
 0x106   : > { %v1448_v22 = vadd.f32 %v1447_v5, %v1428_v17  ;;  %2825 = vmatpush.xpose.msra.mxu2 %v371_v55  ;;  %2785 = vmatpush.xpose.msra.mxu0 %v369_v14  ;;  %v4536_v55 = vld.sshfl [vmem:[#allocation1 + $0x30] sm:$0xff pattern:$0x73625140]  ;;  %v4538_v14 = vld.sshfl [vmem:[#allocation1 + $0x20] sm:$0xff pattern:$0x73625140] }
 0x107   : > { %v1467_v7 = vpop.f32.mrf.mxu2  ;;  %2845 = vmatpush.xpose.msra.mxu3 %v372_v18  ;;  %2805 = vmatpush.xpose.msra.mxu1 %v370_v19  ;;  %v381_v17 = vld [vmem:[%s4016_s30 + $0x360] sm:$0xff]  ;;  %v272_v19 = vld [vmem:[%s4010_s5 + $0xf8] sm:$0xff] }
 0x108   : > { %v1468_v2 = vadd.f32 %v1467_v7, %v1448_v22  ;;  %v1487_v8 = vpop.f32.mrf.mxu3  ;;  %v4543_v18 = vld.sshfl [vmem:[#allocation1 + $0x28] sm:$0xff pattern:$0x73625140]  ;;  %v382_v22 = vld [vmem:[%s4016_s30 + $0x368] sm:$0xff] }
 0x109   : > { %v1507_v10 = vpop.f32.mrf.mxu0  ;;  %713 = vst [vmem:[#allocation1 + $0x20] ss:$4 sm:$0xff] %v272_v19 }
 0x10a   : > { %2904 = vmatpush.xpose.msrb.mxu2 %v503_v20  ;;  %2864 = vmatpush.xpose.msrb.mxu0 %v501_v21  ;;  %v1488_v25 = vadd.f32 %v1487_v8, %v1468_v2  ;;  %v1527_v26 = vpop.f32.mrf.mxu1  ;;  %v384_v21 = vld [vmem:[%s4016_s30 + $0x378] sm:$0xff]  ;;  %v514_v8 = vld [vmem:[%s4016_s30 + $0x788] sm:$0x3] }
 0x10b   : > { %2924 = vmatpush.xpose.msrb.mxu3 %v504_v3  ;;  %2884 = vmatpush.xpose.msrb.mxu1 %v502_v6  ;;  %v515_v3 = vld [vmem:[%s4016_s30 + $0x790] sm:$0x3]  ;;  %v513_v6 = vld [vmem:[%s4016_s30 + $0x780] sm:$0x3]  ;;  %v516_v2 = vld [vmem:[%s4016_s30 + $0x798] sm:$0x3] }
 0x10c   : > { %v1508_v42 = vadd.f32 %v1507_v10, %v1488_v25  ;;  %2826 = vmatmul.f32.vlgmr.msra.gmra.mxu2 %v4431_v23  ;;  %2786 = vmatmul.f32.vlgmr.msra.gmra.mxu0 %v4433_v29  ;;  %v387_v25 = vld [vmem:[%s4016_s30 + $0x390] sm:$0xff] }
 0x10d   : > { %2846 = vmatmul.f32.vlgmr.msra.gmra.mxu3 %v4435_v31  ;;  %2806 = vmatmul.f32.vlgmr.msra.gmra.mxu1 %v4438_v33  ;;  %v379_v33 = vld [vmem:[%s4016_s30 + $0x350] sm:$0xff] }
 0x10e   : > { %v1528_v36 = vadd.f32 %v1527_v26, %v1508_v42  ;;  %2905 = vmatpush.xpose.msrb.mxu2 %v375_v12  ;;  %2865 = vmatpush.xpose.msrb.mxu0 %v373_v39  ;;  %v385_v26 = vld [vmem:[%s4016_s30 + $0x380] sm:$0xff]  ;;  %v386_v42 = vld [vmem:[%s4016_s30 + $0x388] sm:$0xff] }
 0x10f   : > { %v1547_v28 = vpop.f32.mrf.mxu2  ;;  %2925 = vmatpush.xpose.msrb.mxu3 %v376_v43  ;;  %2885 = vmatpush.xpose.msrb.mxu1 %v374_v44  ;;  %v519_v43 = vld [vmem:[%s4016_s30 + $0x7b0] sm:$0x3]  ;;  %v517_v44 = vld [vmem:[%s4016_s30 + $0x7a0] sm:$0x3] }
 0x110   : > { %v1548_v23 = vadd.f32 %v1547_v28, %v1528_v36  ;;  %v1567_v29 = vpop.f32.mrf.mxu3  ;;  %v518_v36 = vld [vmem:[%s4016_s30 + $0x7a8] sm:$0x3]  ;;  %v391_v28 = vld [vmem:[%s4016_s30 + $0x3b0] sm:$0xff] }
 0x111   : > { %v1587_v31 = vpop.f32.mrf.mxu0 }
 0x112   : > { %2984 = vmatpush.xpose.msra.mxu2 %v507_v34  ;;  %2944 = vmatpush.xpose.msra.mxu0 %v505_v35  ;;  %v1568_v46 = vadd.f32 %v1567_v29, %v1548_v23  ;;  %v1607_v47 = vpop.f32.mrf.mxu1  ;;  %v520_v35 = vld [vmem:[%s4016_s30 + $0x7b8] sm:$0x3]  ;;  %v389_v23 = vld [vmem:[%s4016_s30 + $0x3a0] sm:$0xff] }
 0x113   : > { %3004 = vmatpush.xpose.msra.mxu3 %v508_v24  ;;  %2964 = vmatpush.xpose.msra.mxu1 %v506_v27 }
 0x114   : > { %v1588_v63 = vadd.f32 %v1587_v31, %v1568_v46  ;;  %2906 = vmatmul.f32.vlgmr.msrb.gmra.mxu2 %v4452_v38  ;;  %2866 = vmatmul.f32.vlgmr.msrb.gmra.mxu0 %v4454_v54  ;;  %v392_v31 = vld [vmem:[%s4016_s30 + $0x3b8] sm:$0xff]  ;;  %v523_v46 = vld [vmem:[%s4016_s30 + $0x7d0] sm:$0x3] }
 0x115   : > { %2926 = vmatmul.f32.vlgmr.msrb.gmra.mxu3 %v4456_v56  ;;  %2886 = vmatmul.f32.vlgmr.msrb.gmra.mxu1 %v4459_v58  ;;  %v383_v58 = vld [vmem:[%s4016_s30 + $0x370] sm:$0xff] }
 0x116   : > { %v1608_v51 = vadd.f32 %v1607_v47, %v1588_v63  ;;  %2985 = vmatpush.xpose.msra.mxu2 %v379_v33  ;;  %2945 = vmatpush.xpose.msra.mxu0 %v377_v60  ;;  %v390_v33 = vld [vmem:[%s4016_s30 + $0x3a8] sm:$0xff]  ;;  %v521_v47 = vld [vmem:[%s4016_s30 + $0x7c0] sm:$0x3] }
 0x117   : > { %v1627_v52 = vpop.f32.mrf.mxu2  ;;  %3005 = vmatpush.xpose.msra.mxu3 %v380_v0  ;;  %2965 = vmatpush.xpose.msra.mxu1 %v378_v1  ;;  %v522_v63 = vld [vmem:[%s4016_s30 + $0x7c8] sm:$0x3] }
 0x118   : > { %v1628_v38 = vadd.f32 %v1627_v52, %v1608_v51  ;;  %v1647_v54 = vpop.f32.mrf.mxu3  ;;  %v527_v52 = vld [vmem:[%s4016_s30 + $0x7f0] sm:$0x3] }
 0x119   : > { %v1667_v56 = vpop.f32.mrf.mxu0 }
 0x11a   : > { %3064 = vmatpush.xpose.msrb.mxu2 %v511_v48  ;;  %3024 = vmatpush.xpose.msrb.mxu0 %v509_v50  ;;  %v1648_v4 = vadd.f32 %v1647_v54, %v1628_v38  ;;  %v1687_v5 = vpop.f32.mrf.mxu1  ;;  %v395_v48 = vld [vmem:[%s4016_s30 + $0x3d0] sm:$0xff]  ;;  %v393_v50 = vld [vmem:[%s4016_s30 + $0x3c0] sm:$0xff] }
 0x11b   : > { %3084 = vmatpush.xpose.msrb.mxu3 %v512_v45  ;;  %3044 = vmatpush.xpose.msrb.mxu1 %v510_v49  ;;  %v396_v45 = vld [vmem:[%s4016_s30 + $0x3d8] sm:$0xff]  ;;  %v394_v49 = vld [vmem:[%s4016_s30 + $0x3c8] sm:$0xff]  ;;  %v525_v38 = vld [vmem:[%s4016_s30 + $0x7e0] sm:$0x3] }
 0x11c   : > { %v1668_v20 = vadd.f32 %v1667_v56, %v1648_v4  ;;  %2986 = vmatmul.f32.vlgmr.msra.gmra.mxu2 %v4473_v53  ;;  %2946 = vmatmul.f32.vlgmr.msra.gmra.mxu0 %v4475_v11  ;;  %v528_v56 = vld [vmem:[%s4016_s30 + $0x7f8] sm:$0x3] }
 0x11d   : > { %3006 = vmatmul.f32.vlgmr.msra.gmra.mxu3 %v4477_v13  ;;  %2966 = vmatmul.f32.vlgmr.msra.gmra.mxu1 %v4480_v15 }
 0x11e   : > { %v1688_v7 = vadd.f32 %v1687_v5, %v1668_v20  ;;  %3065 = vmatpush.xpose.msrb.mxu2 %v383_v58  ;;  %3025 = vmatpush.xpose.msrb.mxu0 %v381_v17  ;;  %v526_v58 = vld [vmem:[%s4016_s30 + $0x7e8] sm:$0x3]  ;;  %v714_v17 = vld.sshfl [vmem:[#allocation1] sm:$0xff pattern:$0x73625140] }
 0x11f   : > { %v1707_v10 = vpop.f32.mrf.mxu2  ;;  %3085 = vmatpush.xpose.msrb.mxu3 %v384_v21  ;;  %3045 = vmatpush.xpose.msrb.mxu1 %v382_v22  ;;  %v717_v20 = vld.sshfl [vmem:[#allocation1 + $0x18] sm:$0xff pattern:$0x73625140]  ;;  %v715_v21 = vld.sshfl [vmem:[#allocation1 + $0x8] sm:$0xff pattern:$0x73625140] }
 0x120   : > { %v1708_v53 = vadd.f32 %v1707_v10, %v1688_v7  ;;  %v1727_v11 = vpop.f32.mrf.mxu3  ;;  %v399_v22 = vld [vmem:[%s4016_s30 + $0x3f0] sm:$0xff]  ;;  %v400_v7 = vld [vmem:[%s4016_s30 + $0x3f8] sm:$0xff] }
 0x121   : > { %v1747_v13 = vpop.f32.mrf.mxu0 }
 0x122   : > { %3144 = vmatpush.xpose.msra.mxu2 %v515_v3  ;;  %3104 = vmatpush.xpose.msra.mxu0 %v513_v6  ;;  %v1728_v15 = vadd.f32 %v1727_v11, %v1708_v53  ;;  %v1767_v12 = vpop.f32.mrf.mxu1  ;;  %v397_v3 = vld [vmem:[%s4016_s30 + $0x3e0] sm:$0xff] }
 0x123   : > { %3164 = vmatpush.xpose.msra.mxu3 %v516_v2  ;;  %3124 = vmatpush.xpose.msra.mxu1 %v514_v8  ;;  %v398_v2 = vld [vmem:[%s4016_s30 + $0x3e8] sm:$0xff] }
 0x124   : > { %v1748_v39 = vadd.f32 %v1747_v13, %v1728_v15  ;;  %3066 = vmatmul.f32.vlgmr.msrb.gmra.mxu2 %v4494_v9  ;;  %3026 = vmatmul.f32.vlgmr.msrb.gmra.mxu0 %v4496_v32  ;;  %v720_v15 = vld.sshfl [vmem:[#allocation1 + $0x30] sm:$0xff pattern:$0x73625140] }
 0x125   : > { %3086 = vmatmul.f32.vlgmr.msrb.gmra.mxu3 %v4498_v37  ;;  %3046 = vmatmul.f32.vlgmr.msrb.gmra.mxu1 %v4501_v40 }
 0x126   : > { %v1768_v34 = vadd.f32 %v1767_v12, %v1748_v39  ;;  %3145 = vmatpush.xpose.msra.mxu2 %v387_v25  ;;  %3105 = vmatpush.xpose.msra.mxu0 %v385_v26  ;;  %v718_v12 = vld.sshfl [vmem:[#allocation1 + $0x20] sm:$0xff pattern:$0x73625140]  ;;  %v721_v39 = vld.sshfl [vmem:[#allocation1 + $0x38] sm:$0xff pattern:$0x73625140] }
 0x127   : > { %v1787_v24 = vpop.f32.mrf.mxu2  ;;  %3165 = vmatpush.xpose.msra.mxu3 %v388_v41  ;;  %3125 = vmatpush.xpose.msra.mxu1 %v386_v42  ;;  %v719_v41 = vld.sshfl [vmem:[#allocation1 + $0x28] sm:$0xff pattern:$0x73625140] }
 0x128   : > { %v1788_v9 = vadd.f32 %v1787_v24, %v1768_v34  ;;  %v1807_v32 = vpop.f32.mrf.mxu3 }
 0x129   : > { %v1827_v37 = vpop.f32.mrf.mxu0 }
 0x12a   : > { %3224 = vmatpush.xpose.msrb.mxu2 %v519_v43  ;;  %3184 = vmatpush.xpose.msrb.mxu0 %v517_v44  ;;  %v1808_v40 = vadd.f32 %v1807_v32, %v1788_v9  ;;  %v1847_v27 = vpop.f32.mrf.mxu1 }
 0x12b   : > { %3244 = vmatpush.xpose.msrb.mxu3 %v520_v35  ;;  %3204 = vmatpush.xpose.msrb.mxu1 %v518_v36 }
 0x12c   : > { %v1828_v29 = vadd.f32 %v1827_v37, %v1808_v40  ;;  %3146 = vmatmul.f32.vlgmr.msra.gmra.mxu2 %v4515_v30  ;;  %3106 = vmatmul.f32.vlgmr.msra.gmra.mxu0 %v4517_v57 }
 0x12d   : > { %3166 = vmatmul.f32.vlgmr.msra.gmra.mxu3 %v4519_v59  ;;  %3126 = vmatmul.f32.vlgmr.msra.gmra.mxu1 %v4522_v61 }
 0x12e   : > { %v1848_v60 = vadd.f32 %v1847_v27, %v1828_v29  ;;  %3225 = vmatpush.xpose.msrb.mxu2 %v391_v28  ;;  %3185 = vmatpush.xpose.msrb.mxu0 %v389_v23 }
 0x12f   : > { %v1867_v0 = vpop.f32.mrf.mxu2  ;;  %3245 = vmatpush.xpose.msrb.mxu3 %v392_v31  ;;  %3205 = vmatpush.xpose.msrb.mxu1 %v390_v33 }
 0x130   : > { %v1868_v30 = vadd.f32 %v1867_v0, %v1848_v60  ;;  %v1887_v57 = vpop.f32.mrf.mxu3 }
 0x131   : > { %v1907_v59 = vpop.f32.mrf.mxu0 }
 0x132   : > { %3304 = vmatpush.xpose.msra.mxu2 %v523_v46  ;;  %3264 = vmatpush.xpose.msra.mxu0 %v521_v47  ;;  %v1888_v61 = vadd.f32 %v1887_v57, %v1868_v30  ;;  %v1927_v1 = vpop.f32.mrf.mxu1 }
 0x133   : > { %3324 = vmatpush.xpose.msra.mxu3 %v524_v62  ;;  %3284 = vmatpush.xpose.msra.mxu1 %v522_v63 }
 0x134   : > { %v1908_v51 = vadd.f32 %v1907_v59, %v1888_v61  ;;  %3226 = vmatmul.f32.vlgmr.msrb.gmra.mxu2 %v4536_v55  ;;  %3186 = vmatmul.f32.vlgmr.msrb.gmra.mxu0 %v4538_v14 }
 0x135   : > { %3246 = vmatmul.f32.vlgmr.msrb.gmra.mxu3 %v4540_v16  ;;  %3206 = vmatmul.f32.vlgmr.msrb.gmra.mxu1 %v4543_v18  ;;  %v716_v16 = vld.sshfl [vmem:[#allocation1 + $0x10] sm:$0xff pattern:$0x73625140] }
 0x136   : > { %v1928_v54 = vadd.f32 %v1927_v1, %v1908_v51  ;;  %3305 = vmatpush.xpose.msra.mxu2 %v395_v48  ;;  %3265 = vmatpush.xpose.msra.mxu0 %v393_v50 }
 0x137   : > { %v1947_v4 = vpop.f32.mrf.mxu2  ;;  %3325 = vmatpush.xpose.msra.mxu3 %v396_v45  ;;  %3285 = vmatpush.xpose.msra.mxu1 %v394_v49 }
 0x138   : > { %v1948_v55 = vadd.f32 %v1947_v4, %v1928_v54  ;;  %v1967_v5 = vpop.f32.mrf.mxu3 }
 0x139   : > { %v1987_v14 = vpop.f32.mrf.mxu0 }
 0x13a   : > { %3384 = vmatpush.xpose.msrb.mxu2 %v527_v52  ;;  %3344 = vmatpush.xpose.msrb.mxu0 %v525_v38  ;;  %v1968_v18 = vadd.f32 %v1967_v5, %v1948_v55  ;;  %v2007_v19 = vpop.f32.mrf.mxu1 }
 0x13b   : > { %3404 = vmatpush.xpose.msrb.mxu3 %v528_v56  ;;  %3364 = vmatpush.xpose.msrb.mxu1 %v526_v58 }
 0x13c   : > { %v1988_v6 = vadd.f32 %v1987_v14, %v1968_v18  ;;  %3306 = vmatmul.f32.vlgmr.msra.gmra.mxu2 %v716_v16  ;;  %3266 = vmatmul.f32.vlgmr.msra.gmra.mxu0 %v714_v17 }
 0x13d   : > { %3326 = vmatmul.f32.vlgmr.msra.gmra.mxu3 %v717_v20  ;;  %3286 = vmatmul.f32.vlgmr.msra.gmra.mxu1 %v715_v21 }
 0x13e   : > { %v2008_v8 = vadd.f32 %v2007_v19, %v1988_v6  ;;  %3385 = vmatpush.xpose.msrb.mxu2 %v399_v22  ;;  %3345 = vmatpush.xpose.msrb.mxu0 %v397_v3 }
 0x13f   : > { %v2027_v10 = vpop.f32.mrf.mxu2  ;;  %3405 = vmatpush.xpose.msrb.mxu3 %v400_v7  ;;  %3365 = vmatpush.xpose.msrb.mxu1 %v398_v2 }
 0x140   : > { %v2028_v53 = vadd.f32 %v2027_v10, %v2008_v8  ;;  %v2047_v11 = vpop.f32.mrf.mxu3 }
 0x141   : > { %v2067_v13 = vpop.f32.mrf.mxu0 }
 0x142   : > { %v2048_v25 = vadd.f32 %v2047_v11, %v2028_v53  ;;  %v2087_v26 = vpop.f32.mrf.mxu1 }
 0x144   : > { %v2068_v42 = vadd.f32 %v2067_v13, %v2048_v25  ;;  %3386 = vmatmul.f32.vlgmr.msrb.gmra.mxu2 %v720_v15  ;;  %3346 = vmatmul.f32.vlgmr.msrb.gmra.mxu0 %v718_v12 }
 0x145   : > { %3406 = vmatmul.f32.vlgmr.msrb.gmra.mxu3 %v721_v39  ;;  %3366 = vmatmul.f32.vlgmr.msrb.gmra.mxu1 %v719_v41 }
 0x146   : > { %v2088_v43 = vadd.f32 %v2087_v26, %v2068_v42 }
 0x147   : > { %v2107_v44 = vpop.f32.mrf.mxu2 }
 0x148   : > { %v2108_v34 = vadd.f32 %v2107_v44, %v2088_v43  ;;  %v2127_v35 = vpop.f32.mrf.mxu3 }
 0x149   : > { %v2147_v36 = vpop.f32.mrf.mxu0 }
 0x14a   : > { %v2128_v24 = vadd.f32 %v2127_v35, %v2108_v34  ;;  %v2167_v9 = vpop.f32.mrf.mxu1 }
 0x14c   : > { %v2148_v32 = vadd.f32 %v2147_v36, %v2128_v24 }
 0x14e   : > { %v2168_v37 = vadd.f32 %v2167_v9, %v2148_v32 }
 0x14f   : > { %v2187_v40 = vpop.f32.mrf.mxu2 }
 0x150   : > { %v2188_v27 = vadd.f32 %v2187_v40, %v2168_v37  ;;  %v2207_v28 = vpop.f32.mrf.mxu3 }
 0x151   : > { %v2227_v23 = vpop.f32.mrf.mxu0 }
 0x152   : > { %v2208_v29 = vadd.f32 %v2207_v28, %v2188_v27  ;;  %v2247_v31 = vpop.f32.mrf.mxu1 }
 0x154   : > { %v2228_v33 = vadd.f32 %v2227_v23, %v2208_v29 }
 0x156   : > { %v2248_v46 = vadd.f32 %v2247_v31, %v2228_v33 }
 0x157   : > { %v2267_v47 = vpop.f32.mrf.mxu2 }
 0x158   : > { %v2268_v60 = vadd.f32 %v2267_v47, %v2248_v46  ;;  %v2287_v62 = vpop.f32.mrf.mxu3 }
 0x159   : > { %v2307_v63 = vpop.f32.mrf.mxu0 }
 0x15a   : > { %v2288_v0 = vadd.f32 %v2287_v62, %v2268_v60  ;;  %v2327_v30 = vpop.f32.mrf.mxu1 }
 0x15c   : > { %v2308_v57 = vadd.f32 %v2307_v63, %v2288_v0 }
 0x15e   : > { %v2328_v59 = vadd.f32 %v2327_v30, %v2308_v57 }
 0x15f   : > { %v2347_v61 = vpop.f32.mrf.mxu2 }
 0x160   : > { %v2348_v1 = vadd.f32 %v2347_v61, %v2328_v59  ;;  %v2367_v48 = vpop.f32.mrf.mxu3 }
 0x161   : > { %v2387_v50 = vpop.f32.mrf.mxu0 }
 0x162   : > { %v2368_v51 = vadd.f32 %v2367_v48, %v2348_v1  ;;  %v2407_v45 = vpop.f32.mrf.mxu1 }
 0x164   : > { %v2388_v49 = vadd.f32 %v2387_v50, %v2368_v51 }
 0x166   : > { %v2408_v52 = vadd.f32 %v2407_v45, %v2388_v49 }
 0x167   : > { %v2427_v38 = vpop.f32.mrf.mxu2 }
 0x168   : > { %v2428_v54 = vadd.f32 %v2427_v38, %v2408_v52  ;;  %v2447_v56 = vpop.f32.mrf.mxu3 }
 0x169   : > { %v2467_v58 = vpop.f32.mrf.mxu0 }
 0x16a   : > { %v2448_v4 = vadd.f32 %v2447_v56, %v2428_v54  ;;  %v2487_v55 = vpop.f32.mrf.mxu1 }
 0x16c   : > { %v2468_v5 = vadd.f32 %v2467_v58, %v2448_v4 }
 0x16e   : > { %v2488_v14 = vadd.f32 %v2487_v55, %v2468_v5 }
 0x16f   : > { %v2507_v16 = vpop.f32.mrf.mxu2 }
 0x170   : > { %v2508_v17 = vadd.f32 %v2507_v16, %v2488_v14  ;;  %v2527_v18 = vpop.f32.mrf.mxu3 }
 0x171   : > { %v2547_v19 = vpop.f32.mrf.mxu0 }
 0x172   : > { %v2528_v20 = vadd.f32 %v2527_v18, %v2508_v17  ;;  %v2567_v21 = vpop.f32.mrf.mxu1 }
 0x174   : > { %v2548_v22 = vadd.f32 %v2547_v19, %v2528_v20 }
 0x176   : > { %v2568_v3 = vadd.f32 %v2567_v21, %v2548_v22 }
 0x177   : > { %v2587_v6 = vpop.f32.mrf.mxu2 }
 0x178   : > { %v2588_v7 = vadd.f32 %v2587_v6, %v2568_v3  ;;  %v2607_v2 = vpop.f32.mrf.mxu3 }
 0x179   : > { %v2627_v8 = vpop.f32.mrf.mxu0 }
 0x17a   : > { %v2608_v10 = vadd.f32 %v2607_v2, %v2588_v7  ;;  %v2647_v53 = vpop.f32.mrf.mxu1 }
 0x17c   : > { %v2628_v11 = vadd.f32 %v2627_v8, %v2608_v10 }
 0x17e   : > { %v2648_v13 = vadd.f32 %v2647_v53, %v2628_v11 }
 0x17f   : > { %v2667_v15 = vpop.f32.mrf.mxu2 }
 0x180   : > { %v2668_v12 = vadd.f32 %v2667_v15, %v2648_v13  ;;  %v2687_v25 = vpop.f32.mrf.mxu3 }
 0x181   : > { %v2707_v26 = vpop.f32.mrf.mxu0 }
 0x182   : > { %v2688_v39 = vadd.f32 %v2687_v25, %v2668_v12  ;;  %v2727_v41 = vpop.f32.mrf.mxu1 }
 0x184   : > { %v2708_v42 = vadd.f32 %v2707_v26, %v2688_v39 }
 0x186   : > { %v2728_v43 = vadd.f32 %v2727_v41, %v2708_v42 }
 0x187   : > { %v2747_v44 = vpop.f32.mrf.mxu2 }
 0x188   : > { %v2748_v34 = vadd.f32 %v2747_v44, %v2728_v43  ;;  %v2767_v35 = vpop.f32.mrf.mxu3 }
 0x189   : > { %v2787_v36 = vpop.f32.mrf.mxu0 }
 0x18a   : > { %v2768_v24 = vadd.f32 %v2767_v35, %v2748_v34  ;;  %v2807_v9 = vpop.f32.mrf.mxu1 }
 0x18c   : > { %v2788_v32 = vadd.f32 %v2787_v36, %v2768_v24  ;;  %v240_v36 = vld [vmem:[%s4025_s8] sm:$0x3] }
 0x18e   : > { %v2808_v37 = vadd.f32 %v2807_v9, %v2788_v32 }
 0x18f   : > { %v2827_v40 = vpop.f32.mrf.mxu2 }
 0x190   : > { %v2828_v27 = vadd.f32 %v2827_v40, %v2808_v37  ;;  %v2847_v28 = vpop.f32.mrf.mxu3 }
 0x191   : > { %v2867_v23 = vpop.f32.mrf.mxu0 }
 0x192   : > { %v2848_v29 = vadd.f32 %v2847_v28, %v2828_v27  ;;  %v2887_v31 = vpop.f32.mrf.mxu1 }
 0x194   : > { %v2868_v33 = vadd.f32 %v2867_v23, %v2848_v29 }
 0x196   : > { %v2888_v46 = vadd.f32 %v2887_v31, %v2868_v33 }
 0x197   : > { %v2907_v47 = vpop.f32.mrf.mxu2 }
 0x198   : > { %v2908_v60 = vadd.f32 %v2907_v47, %v2888_v46  ;;  %v2927_v62 = vpop.f32.mrf.mxu3 }
 0x199   : > { %v2947_v63 = vpop.f32.mrf.mxu0 }
 0x19a   : > { %v2928_v0 = vadd.f32 %v2927_v62, %v2908_v60  ;;  %v2967_v30 = vpop.f32.mrf.mxu1 }
 0x19c   : > { %v2948_v57 = vadd.f32 %v2947_v63, %v2928_v0 }
 0x19e   : > { %v2968_v59 = vadd.f32 %v2967_v30, %v2948_v57 }
 0x19f   : > { %v2987_v61 = vpop.f32.mrf.mxu2 }
 0x1a0   : > { %v2988_v1 = vadd.f32 %v2987_v61, %v2968_v59  ;;  %v3007_v48 = vpop.f32.mrf.mxu3 }
 0x1a1   : > { %v3027_v50 = vpop.f32.mrf.mxu0 }
 0x1a2   : > { %v3008_v51 = vadd.f32 %v3007_v48, %v2988_v1  ;;  %v3047_v45 = vpop.f32.mrf.mxu1 }
 0x1a4   : > { %v3028_v49 = vadd.f32 %v3027_v50, %v3008_v51 }
 0x1a6   : > { %v3048_v52 = vadd.f32 %v3047_v45, %v3028_v49 }
 0x1a7   : > { %v3067_v38 = vpop.f32.mrf.mxu2 }
 0x1a8   : > { %v3068_v54 = vadd.f32 %v3067_v38, %v3048_v52  ;;  %v3087_v56 = vpop.f32.mrf.mxu3 }
 0x1a9   : > { %v3107_v58 = vpop.f32.mrf.mxu0 }
 0x1aa   : > { %v3088_v4 = vadd.f32 %v3087_v56, %v3068_v54  ;;  %v3127_v55 = vpop.f32.mrf.mxu1 }
 0x1ac   : > { %v3108_v5 = vadd.f32 %v3107_v58, %v3088_v4 }
 0x1ae   : > { %v3128_v14 = vadd.f32 %v3127_v55, %v3108_v5 }
 0x1af   : > { %v3147_v16 = vpop.f32.mrf.mxu2 }
 0x1b0   : > { %v3148_v17 = vadd.f32 %v3147_v16, %v3128_v14  ;;  %v3167_v18 = vpop.f32.mrf.mxu3 }
 0x1b1   : > { %v3187_v19 = vpop.f32.mrf.mxu0 }
 0x1b2   : > { %v3168_v20 = vadd.f32 %v3167_v18, %v3148_v17  ;;  %v3207_v21 = vpop.f32.mrf.mxu1 }
 0x1b4   : > { %v3188_v22 = vadd.f32 %v3187_v19, %v3168_v20 }
 0x1b6   : > { %v3208_v3 = vadd.f32 %v3207_v21, %v3188_v22 }
 0x1b7   : > { %v3227_v6 = vpop.f32.mrf.mxu2 }
 0x1b8   : > { %v3228_v7 = vadd.f32 %v3227_v6, %v3208_v3  ;;  %v3247_v2 = vpop.f32.mrf.mxu3 }
 0x1b9   : > { %v3267_v8 = vpop.f32.mrf.mxu0 }
 0x1ba   : > { %v3248_v10 = vadd.f32 %v3247_v2, %v3228_v7  ;;  %v3287_v53 = vpop.f32.mrf.mxu1 }
 0x1bc   : > { %v3268_v11 = vadd.f32 %v3267_v8, %v3248_v10 }
 0x1be   : > { %v3288_v13 = vadd.f32 %v3287_v53, %v3268_v11 }
 0x1bf   : > { %v3307_v15 = vpop.f32.mrf.mxu2 }
 0x1c0   : > { %v3308_v12 = vadd.f32 %v3307_v15, %v3288_v13  ;;  %v3327_v25 = vpop.f32.mrf.mxu3 }
 0x1c1   : > { %v3347_v26 = vpop.f32.mrf.mxu0 }
 0x1c2   : > { %v3328_v39 = vadd.f32 %v3327_v25, %v3308_v12  ;;  %v3367_v41 = vpop.f32.mrf.mxu1 }
 0x1c4   : > { %v3348_v42 = vadd.f32 %v3347_v26, %v3328_v39 }
 0x1c6   : > { %v3368_v43 = vadd.f32 %v3367_v41, %v3348_v42 }
 0x1c7   : > { %v3387_v44 = vpop.f32.mrf.mxu2 }
 0x1c8   : > { %v3388_v34 = vadd.f32 %v3387_v44, %v3368_v43  ;;  %v3407_v35 = vpop.f32.mrf.mxu3 }
 0x1ca   : > { %v3408_v24 = vadd.f32 %v3407_v35, %v3388_v34 }
 0x1cc   : > { %v3410_v9 = vadd.f32 %v3408_v24, %v240_v36 }
 0x1ce   : > { %3412 = vst.msk [vmem:[%s4025_s8] sm:$0x3] %vm3411_vm1, %v3410_v9 }
 0x1cf   : > { %3756 = shalt.err (!%p3753_p1)
}
 0x1d0   : > { %3562 = dma.vmem_to_hbm [thread:$0]  (%p3965_p13), %s3427_s3, 32, %s3429_s27, %s3414_s16  }
 0x1d1 PF: > { %p3576_p3 = scmp.ge.s32.totalorder %s3855_s19, 2  ;;  %s3440_s22 = sand.u32 1, %s3815_s9  }
 0x1d2   : > { %s3441_s12 = scalar_lea.sflag [#allocation4], %s3440_s22 }
 0x1d3   : > { %p3572_p4 = pnand %p3576_p3, %p3981_p2 }
 0x1d5   : > { %p3573_p6 = pneg %p3572_p4 }
 0x1d7   : > { %3810 = dma.done.wait (%p3573_p6), %s3441_s12, 32  }
 0x1d8   : > { %3812 = vsyncadd (%p3573_p6), %s3441_s12, 4294967264  ;;  %s21_s19 = sadd.s32 1, %s3855_s19   ;;  %s4671_s6 = sld [smem:[#allocation15_spill]] }
 0x1d9   : > { %p18_p5 = scmp.ge.s32.totalorder %s21_s19, 14   ;;  %s4672_s15 = sld [smem:[#allocation11_spill]] }
 0x1da   : > { %s4673_s16 = sld [smem:[#allocation12_spill]]  ;;  %s4676_s9 = smov %s3819_s10 }
 0x1db   : > { %s4674_s17 = sld [smem:[#allocation13_spill]]  ;;  %s4677_s10 = smov %s3823_s11 }
 0x1dc   : > { %s4675_s18 = sld [smem:[#allocation14_spill]]  ;;  %s4678_s11 = smov %s3970_s7 }
 0x1dd   : > { %s4679_s12 = smov %s3831_s13  ;;  %s4680_s13 = smov %s3835_s14 }
 0x1de   : > { %s4681_s14 = smov %s4671_s6  ;;  %20 = sbr.rel (!%p18_p5) target bundleno = 13 (0xd), region = 91 }
 0x1e3   :  { %3447 = vsyncpa [#allocation3], 1 }
 0x1e4   :  { %3449 = vsyncpa [#allocation3 + $0x1], 1 }
 0x1e5   :  { %3450 = vsyncpa [#allocation6], 1 }
 0x1e6   :  { %3452 = vsyncpa [#allocation6 + $0x1], 1 }
 0x1e7   :  { %3453 = vsyncpa [#allocation4], 1 }
 0x1e8   :  { %3455 = vsyncpa [#allocation4 + $0x1], 1 }

</bundles_post_ra>
